<compile_context>
chip_gen: v7x
topology: tpu7x:2x2x1
jax: 0.10.0
libtpu: 0.0.40
codegen_flags: <defaults>
</compile_context>

<pallas_src>
import functools

import jax
import jax.numpy as jnp
from jax.experimental import pallas as pl
from jax.experimental.pallas import tpu as pltpu


# ----------------------------------------------------------------------------
# Fused kernel: GAT1 -> TransformerEncoderLayer (post-norm) -> GAT2
# ----------------------------------------------------------------------------
def _gnn_fused_kernel(heads1, c1, nhead, negative_slope,
                      x_ref, mask_ref,
                      w1_ref, adst1_ref, asrc1t_ref, b1_ref,
                      wqkv_ref, bqkv_ref, wo_ref, bo_ref,
                      wf1_ref, bf1_ref, wf2_ref, bf2_ref,
                      g1_ref, be1_ref, g2_ref, be2_ref,
                      w2_ref, adst2_ref, asrc2t_ref, b2_ref,
                      o_ref, hbuf, abuf):
    f32 = jnp.float32
    d_model = heads1 * c1
    head_dim = d_model // nhead

    def mm(a, b):                      # a @ b       : bf16 operands, f32 accum
        return jax.lax.dot_general(
            a.astype(jnp.bfloat16), b.astype(jnp.bfloat16),
            (((1,), (0,)), ((), ())), preferred_element_type=f32)

    def mm_nt(a, b):                   # a @ b.T     : contract last dims on MXU
        return jax.lax.dot_general(
            a.astype(jnp.bfloat16), b.astype(jnp.bfloat16),
            (((1,), (1,)), ((), ())), preferred_element_type=f32)

    def masked_softmax(e, mask):
        e = jnp.where(e > 0, e, negative_slope * e)      # LeakyReLU(0.2)
        e = e + mask                                     # -1e9 on non-edges
        e = e - jnp.max(e, axis=-1, keepdims=True)
        p = jnp.exp(e)                                   # non-edges underflow to 0
        return p * pl.reciprocal(jnp.sum(p, axis=-1, keepdims=True), approx=True)

    def layernorm(y, gamma, beta):
        mean = jnp.mean(y, axis=-1, keepdims=True)
        var = jnp.mean((y - mean) * (y - mean), axis=-1, keepdims=True)
        return (y - mean) * jax.lax.rsqrt(var + 1e-5) * gamma + beta

    mask = mask_ref[...].astype(f32)                     # (N, N) additive mask

    # ---- GAT1: heads1 heads of width c1, concat + bias + ELU ----------------
    x0 = x_ref[...]
    h = mm(x0, w1_ref[...])                              # (N, heads1*c1)
    a_dst = mm(h, adst1_ref[...])                        # (N, heads1)   MXU
    a_srcT = mm_nt(asrc1t_ref[...], h)                   # (heads1, N)   MXU
    for hd in range(heads1):
        e = a_dst[:, hd:hd + 1] + a_srcT[hd:hd + 1, :]   # (N, N) logits
        p = masked_softmax(e, mask)                      # per-target softmax
        hbuf[:, hd * c1:(hd + 1) * c1] = mm(p, h[:, hd * c1:(hd + 1) * c1])
    x1 = hbuf[...] + b1_ref[...]
    x1 = jnp.where(x1 > 0, x1, jnp.exp(jnp.minimum(x1, 0.0)) - 1.0)   # F.elu

    # ---- TransformerEncoderLayer (post-norm, ReLU FFN, batch==1 folded) -----
    qkv = mm(x1, wqkv_ref[...]) + bqkv_ref[...]          # fused QKV: (N, 3D)
    q = qkv[:, 0:d_model]
    k = qkv[:, d_model:2 * d_model]
    v = qkv[:, 2 * d_model:3 * d_model]
    scale = f32(float(head_dim) ** -0.5)
    for hd in range(nhead):
        sl = slice(hd * head_dim, (hd + 1) * head_dim)
        s = mm_nt(q[:, sl] * scale, k[:, sl])            # (N, N)
        s = s - jnp.max(s, axis=-1, keepdims=True)
        p = jnp.exp(s)
        p = p * pl.reciprocal(jnp.sum(p, axis=-1, keepdims=True), approx=True)
        abuf[:, sl] = mm(p, v[:, sl])
    attn = mm(abuf[...], wo_ref[...]) + bo_ref[...]
    y = layernorm(x1 + attn, g1_ref[...], be1_ref[...])                  # norm1
    ff = jnp.maximum(mm(y, wf1_ref[...]) + bf1_ref[...], 0.0)            # ReLU
    x2 = layernorm(y + mm(ff, wf2_ref[...]) + bf2_ref[...],
                   g2_ref[...], be2_ref[...])                            # norm2

    # ---- GAT2: single head, output padded to 128 lanes ----------------------
    h2 = mm(x2, w2_ref[...])                             # (N, out_pad)
    a_dst2 = mm(h2, adst2_ref[...])                      # (N, 1)
    a_src2T = mm_nt(asrc2t_ref[...], h2)                 # (1, N)
    p2 = masked_softmax(a_dst2 + a_src2T, mask)
    o_ref[...] = mm(p2, h2) + b2_ref[...]


# ----------------------------------------------------------------------------
# Host-side parameter packing / adjacency mask
# ----------------------------------------------------------------------------
def _block_diag_att(att):
    # att: (H, C) -> (H*C, H) with entry [h*C + c, h] = att[h, c]
    H, C = att.shape
    eye = jnp.eye(H, dtype=att.dtype)
    return (att[:, :, None] * eye[:, None, :]).reshape(H * C, H)


def pack_params(params, out_pad):
    bf16 = jnp.bfloat16
    g1, xf, g2 = params["gat1"], params["xf"], params["gat2"]

    adst1 = _block_diag_att(g1["att_dst"]).astype(bf16)            # (H*C, H)
    asrc1t = _block_diag_att(g1["att_src"]).T.astype(bf16)         # (H, H*C)

    wqkv = jnp.concatenate([xf["wq"], xf["wk"], xf["wv"]], axis=1).astype(bf16)
    bqkv = jnp.concatenate([xf["bq"], xf["bk"], xf["bv"]], axis=1)

    out_dim = g2["w"].shape[1]
    pad = out_pad - out_dim
    w2 = jnp.pad(g2["w"], ((0, 0), (0, pad))).astype(bf16)         # (D, out_pad)
    adst2 = jnp.pad(_block_diag_att(g2["att_dst"]),
                    ((0, pad), (0, 0))).astype(bf16)               # (out_pad, 1)
    asrc2t = jnp.pad(_block_diag_att(g2["att_src"]).T,
                     ((0, 0), (0, pad))).astype(bf16)              # (1, out_pad)
    b2 = jnp.pad(g2["bias"], ((0, 0), (0, pad)))                   # (1, out_pad)

    return (g1["w"].astype(bf16), adst1, asrc1t, g1["bias"],
            wqkv, bqkv, xf["wo"].astype(bf16), xf["bo"],
            xf["w1"].astype(bf16), xf["b1"], xf["w2"].astype(bf16), xf["b2"],
            xf["g1"], xf["be1"], xf["g2"], xf["be2"],
            w2, adst2, asrc2t, b2)


def build_mask(edge_index, num_nodes):
    # Additive mask: 0 where edge j->i (plus self loops, PyG default), -1e9 else.
    src, dst = edge_index[0], edge_index[1]
    adj = jnp.zeros((num_nodes, num_nodes), jnp.float32)
    adj = adj.at[dst, src].set(1.0)
    idx = jnp.arange(num_nodes)
    adj = adj.at[idx, idx].set(1.0)
    return jnp.where(adj > 0, 0.0, -1e9).astype(jnp.bfloat16)


# ----------------------------------------------------------------------------
# Parameter init (natural PyTorch-like shapes; weights oriented for y = x @ W + b)
# ----------------------------------------------------------------------------
def init_params(key, input_dim, hidden_dim, output_dim, dim_feedforward=2048):
    d_model = hidden_dim * 4                       # GAT1: 4 heads, concat=True
    keys = jax.random.split(key, 16)

    def rnd(k, shape, scale=0.1):
        return (scale * jax.random.normal(k, shape)).astype(jnp.float32)

    zeros = lambda shape: jnp.zeros(shape, jnp.float32)
    ones = lambda shape: jnp.ones(shape, jnp.float32)

    return {
        # GATConv(input_dim, hidden_dim, heads=4)
        "gat1": {
            "w": rnd(keys[0], (input_dim, 4 * hidden_dim)),
            "att_src": rnd(keys[1], (4, hidden_dim)),
            "att_dst": rnd(keys[2], (4, hidden_dim)),
            "bias": zeros((1, 4 * hidden_dim)),
        },
        # TransformerEncoderLayer(d_model=4*hidden, nhead=4, dim_feedforward=2048)
        "xf": {
            "wq": rnd(keys[3], (d_model, d_model)),
            "wk": rnd(keys[4], (d_model, d_model)),
            "wv": rnd(keys[5], (d_model, d_model)),
            "bq": zeros((1, d_model)),
            "bk": zeros((1, d_model)),
            "bv": zeros((1, d_model)),
            "wo": rnd(keys[6], (d_model, d_model)),
            "bo": zeros((1, d_model)),
            "w1": rnd(keys[7], (d_model, dim_feedforward)),
            "b1": zeros((1, dim_feedforward)),
            "w2": rnd(keys[8], (dim_feedforward, d_model)),
            "b2": zeros((1, d_model)),
            "g1": ones((1, d_model)), "be1": zeros((1, d_model)),
            "g2": ones((1, d_model)), "be2": zeros((1, d_model)),
        },
        # GATConv(4*hidden, output_dim, heads=1)
        "gat2": {
            "w": rnd(keys[9], (d_model, output_dim)),
            "att_src": rnd(keys[10], (1, output_dim)),
            "att_dst": rnd(keys[11], (1, output_dim)),
            "bias": zeros((1, output_dim)),
        },
    }


# ----------------------------------------------------------------------------
# Forward (single pallas_call)
# ----------------------------------------------------------------------------
def gnn_encoder_forward(params, x, edge_index, *, hidden_dim, output_dim,
                        heads1=4, nhead=4):
    n = x.shape[0]
    d_model = heads1 * hidden_dim
    out_pad = ((output_dim + 127) // 128) * 128            # lane-dense HBM store

    mask = build_mask(edge_index, n)
    packed = pack_params(params, out_pad)
    args = (x.astype(jnp.float32), mask) + packed

    vmem = pl.BlockSpec(memory_space=pltpu.MemorySpace.VMEM)
    kernel = functools.partial(_gnn_fused_kernel, heads1, hidden_dim, nhead, 0.2)

    out_padded = pl.pallas_call(
        kernel,
        out_shape=jax.ShapeDtypeStruct((n, out_pad), jnp.float32),
        in_specs=[vmem] * len(args),
        out_specs=vmem,
        scratch_shapes=[pltpu.VMEM((n, d_model), jnp.float32),   # GAT1 head buf
                        pltpu.VMEM((n, d_model), jnp.float32)],  # attn head buf
        compiler_params=pltpu.CompilerParams(
            vmem_limit_bytes=48 * 1024 * 1024),
    )(*args)
    return out_padded[:, :output_dim]


if __name__ == "__main__":
    num_nodes = 16
    input_dim = 12
    hidden_dim = 8          # -> transformer d_model = 32
    output_dim = 16

    key = jax.random.PRNGKey(0)
    k_x, k_param = jax.random.split(key)

    x = jax.random.normal(k_x, (num_nodes, input_dim), dtype=jnp.float32)

    # simple bidirectional ring graph: edge_index shape (2, 2*N)
    src = jnp.arange(num_nodes, dtype=jnp.int32)
    dst = (src + 1) % num_nodes
    edge_index = jnp.stack([jnp.concatenate([src, dst]),
                            jnp.concatenate([dst, src])], axis=0)

    params = init_params(k_param, input_dim, hidden_dim, output_dim)

    out = gnn_encoder_forward(params, x, edge_index,
                              hidden_dim=hidden_dim, output_dim=output_dim)
    out = jax.block_until_ready(out)
    assert out.shape == (num_nodes, output_dim), out.shape
    assert bool(jnp.all(jnp.isfinite(out)))
    print("KERNEL_OK")
</pallas_src>

<mosaic_0001>
module attributes {stable_mosaic.version = 11 : i64} {
  func.func @_gnn_fused_kernel(%arg0: memref<16x12xf32, #tpu.memory_space<vmem>>, %arg1: memref<16x16xbf16, #tpu.memory_space<vmem>>, %arg2: memref<12x32xbf16, #tpu.memory_space<vmem>>, %arg3: memref<32x4xbf16, #tpu.memory_space<vmem>>, %arg4: memref<4x32xbf16, #tpu.memory_space<vmem>>, %arg5: memref<1x32xf32, #tpu.memory_space<vmem>>, %arg6: memref<32x96xbf16, #tpu.memory_space<vmem>>, %arg7: memref<1x96xf32, #tpu.memory_space<vmem>>, %arg8: memref<32x32xbf16, #tpu.memory_space<vmem>>, %arg9: memref<1x32xf32, #tpu.memory_space<vmem>>, %arg10: memref<32x2048xbf16, #tpu.memory_space<vmem>>, %arg11: memref<1x2048xf32, #tpu.memory_space<vmem>>, %arg12: memref<2048x32xbf16, #tpu.memory_space<vmem>>, %arg13: memref<1x32xf32, #tpu.memory_space<vmem>>, %arg14: memref<1x32xf32, #tpu.memory_space<vmem>>, %arg15: memref<1x32xf32, #tpu.memory_space<vmem>>, %arg16: memref<1x32xf32, #tpu.memory_space<vmem>>, %arg17: memref<1x32xf32, #tpu.memory_space<vmem>>, %arg18: memref<32x128xbf16, #tpu.memory_space<vmem>>, %arg19: memref<128x1xbf16, #tpu.memory_space<vmem>>, %arg20: memref<1x128xbf16, #tpu.memory_space<vmem>>, %arg21: memref<1x128xf32, #tpu.memory_space<vmem>>, %arg22: memref<16x128xf32, #tpu.memory_space<vmem>>, %arg23: memref<16x32xf32, #tpu.memory_space<vmem>>, %arg24: memref<16x32xf32, #tpu.memory_space<vmem>>) attributes {dimension_semantics = [], scalar_prefetch = 0 : i64, scratch_operands = 2 : i64, tpu.core_type = #tpu.core_type<tc>} {
    %c0 = arith.constant 0 : index
    %c0_0 = arith.constant 0 : index
    %0 = vector.load %arg1[%c0, %c0_0] : memref<16x16xbf16, #tpu.memory_space<vmem>>, vector<16x16xbf16>
    %1 = arith.extf %0 : vector<16x16xbf16> to vector<16x16xf32>
    %c0_1 = arith.constant 0 : index
    %c0_2 = arith.constant 0 : index
    %2 = vector.load %arg0[%c0_1, %c0_2] : memref<16x12xf32, #tpu.memory_space<vmem>>, vector<16x12xf32>
    %c0_3 = arith.constant 0 : index
    %c0_4 = arith.constant 0 : index
    %3 = vector.load %arg2[%c0_3, %c0_4] : memref<12x32xbf16, #tpu.memory_space<vmem>>, vector<12x32xbf16>
    %4 = arith.truncf %2 : vector<16x12xf32> to vector<16x12xbf16>
    %cst = arith.constant dense<0.000000e+00> : vector<16x32xf32>
    %5 = tpu.matmul %4, %3, %cst {dimension_numbers = #tpu.dot_dimension_numbers<[1], [0], [0], [1], [0, 0, 1, 1], [], []>} : vector<16x12xbf16>, vector<12x32xbf16>, vector<16x32xf32> -> vector<16x32xf32>
    %c0_5 = arith.constant 0 : index
    %c0_6 = arith.constant 0 : index
    %6 = vector.load %arg3[%c0_5, %c0_6] : memref<32x4xbf16, #tpu.memory_space<vmem>>, vector<32x4xbf16>
    %7 = arith.truncf %5 : vector<16x32xf32> to vector<16x32xbf16>
    %cst_7 = arith.constant dense<0.000000e+00> : vector<16x4xf32>
    %8 = tpu.matmul %7, %6, %cst_7 {dimension_numbers = #tpu.dot_dimension_numbers<[1], [0], [0], [1], [0, 0, 1, 1], [], []>} : vector<16x32xbf16>, vector<32x4xbf16>, vector<16x4xf32> -> vector<16x4xf32>
    %c0_8 = arith.constant 0 : index
    %c0_9 = arith.constant 0 : index
    %9 = vector.load %arg4[%c0_8, %c0_9] : memref<4x32xbf16, #tpu.memory_space<vmem>>, vector<4x32xbf16>
    %10 = arith.truncf %5 : vector<16x32xf32> to vector<16x32xbf16>
    %cst_10 = arith.constant dense<0.000000e+00> : vector<4x16xf32>
    %11 = tpu.matmul %9, %10, %cst_10 {dimension_numbers = #tpu.dot_dimension_numbers<[1], [1], [0], [0], [0, 0, 1, 0], [], []>} : vector<4x32xbf16>, vector<16x32xbf16>, vector<4x16xf32> -> vector<4x16xf32>
    %12 = vector.extract_strided_slice %8 {offsets = [0, 0], sizes = [16, 1], strides = [1, 1]} : vector<16x4xf32> to vector<16x1xf32>
    %13 = vector.extract_strided_slice %11 {offsets = [0, 0], sizes = [1, 16], strides = [1, 1]} : vector<4x16xf32> to vector<1x16xf32>
    %14 = vector.broadcast %12 : vector<16x1xf32> to vector<16x16xf32>
    %15 = vector.broadcast %13 : vector<1x16xf32> to vector<16x16xf32>
    %16 = arith.addf %14, %15 : vector<16x16xf32>
    %cst_11 = arith.constant 0.000000e+00 : f32
    %17 = vector.broadcast %cst_11 : f32 to vector<16x16xf32>
    %18 = arith.cmpf ogt, %16, %17 : vector<16x16xf32>
    %cst_12 = arith.constant 2.000000e-01 : f32
    %19 = vector.broadcast %cst_12 : f32 to vector<16x16xf32>
    %20 = arith.mulf %19, %16 : vector<16x16xf32>
    %21 = arith.select %18, %16, %20 : vector<16x16xi1>, vector<16x16xf32>
    %22 = arith.addf %21, %1 : vector<16x16xf32>
    %cst_13 = arith.constant dense<0xFF800000> : vector<16xf32>
    %23 = vector.multi_reduction <maximumf>, %22, %cst_13 [1] : vector<16x16xf32> to vector<16xf32>
    %24 = vector.shape_cast %23 : vector<16xf32> to vector<16x1xf32>
    %25 = vector.broadcast %24 : vector<16x1xf32> to vector<16x16xf32>
    %26 = arith.subf %22, %25 : vector<16x16xf32>
    %27 = math.exp %26 : vector<16x16xf32>
    %cst_14 = arith.constant dense<0.000000e+00> : vector<16xf32>
    %28 = vector.multi_reduction <add>, %27, %cst_14 [1] : vector<16x16xf32> to vector<16xf32>
    %29 = vector.shape_cast %28 : vector<16xf32> to vector<16x1xf32>
    %30 = tpu.reciprocal %29 {approx = true} : vector<16x1xf32> -> vector<16x1xf32>
    %31 = vector.broadcast %30 : vector<16x1xf32> to vector<16x16xf32>
    %32 = arith.mulf %27, %31 : vector<16x16xf32>
    %33 = vector.extract_strided_slice %5 {offsets = [0, 0], sizes = [16, 8], strides = [1, 1]} : vector<16x32xf32> to vector<16x8xf32>
    %34 = arith.truncf %32 : vector<16x16xf32> to vector<16x16xbf16>
    %35 = arith.truncf %33 : vector<16x8xf32> to vector<16x8xbf16>
    %cst_15 = arith.constant dense<0.000000e+00> : vector<16x8xf32>
    %36 = tpu.matmul %34, %35, %cst_15 {dimension_numbers = #tpu.dot_dimension_numbers<[1], [0], [0], [1], [0, 0, 1, 1], [], []>} : vector<16x16xbf16>, vector<16x8xbf16>, vector<16x8xf32> -> vector<16x8xf32>
    %c0_16 = arith.constant 0 : index
    %c0_17 = arith.constant 0 : index
    %37 = vector.load %arg23[%c0_16, %c0_17] : memref<16x32xf32, #tpu.memory_space<vmem>>, vector<16x8xf32>
    tpu.vector_store %arg23[%c0_16, %c0_17], %36 {strides = array<i32>} : memref<16x32xf32, #tpu.memory_space<vmem>>, vector<16x8xf32>,
    %38 = vector.extract_strided_slice %8 {offsets = [0, 1], sizes = [16, 1], strides = [1, 1]} : vector<16x4xf32> to vector<16x1xf32>
    %39 = vector.extract_strided_slice %11 {offsets = [1, 0], sizes = [1, 16], strides = [1, 1]} : vector<4x16xf32> to vector<1x16xf32>
    %40 = vector.broadcast %38 : vector<16x1xf32> to vector<16x16xf32>
    %41 = vector.broadcast %39 : vector<1x16xf32> to vector<16x16xf32>
    %42 = arith.addf %40, %41 : vector<16x16xf32>
    %cst_18 = arith.constant 0.000000e+00 : f32
    %43 = vector.broadcast %cst_18 : f32 to vector<16x16xf32>
    %44 = arith.cmpf ogt, %42, %43 : vector<16x16xf32>
    %cst_19 = arith.constant 2.000000e-01 : f32
    %45 = vector.broadcast %cst_19 : f32 to vector<16x16xf32>
    %46 = arith.mulf %45, %42 : vector<16x16xf32>
    %47 = arith.select %44, %42, %46 : vector<16x16xi1>, vector<16x16xf32>
    %48 = arith.addf %47, %1 : vector<16x16xf32>
    %cst_20 = arith.constant dense<0xFF800000> : vector<16xf32>
    %49 = vector.multi_reduction <maximumf>, %48, %cst_20 [1] : vector<16x16xf32> to vector<16xf32>
    %50 = vector.shape_cast %49 : vector<16xf32> to vector<16x1xf32>
    %51 = vector.broadcast %50 : vector<16x1xf32> to vector<16x16xf32>
    %52 = arith.subf %48, %51 : vector<16x16xf32>
    %53 = math.exp %52 : vector<16x16xf32>
    %cst_21 = arith.constant dense<0.000000e+00> : vector<16xf32>
    %54 = vector.multi_reduction <add>, %53, %cst_21 [1] : vector<16x16xf32> to vector<16xf32>
    %55 = vector.shape_cast %54 : vector<16xf32> to vector<16x1xf32>
    %56 = tpu.reciprocal %55 {approx = true} : vector<16x1xf32> -> vector<16x1xf32>
    %57 = vector.broadcast %56 : vector<16x1xf32> to vector<16x16xf32>
    %58 = arith.mulf %53, %57 : vector<16x16xf32>
    %59 = vector.extract_strided_slice %5 {offsets = [0, 8], sizes = [16, 8], strides = [1, 1]} : vector<16x32xf32> to vector<16x8xf32>
    %60 = arith.truncf %58 : vector<16x16xf32> to vector<16x16xbf16>
    %61 = arith.truncf %59 : vector<16x8xf32> to vector<16x8xbf16>
    %cst_22 = arith.constant dense<0.000000e+00> : vector<16x8xf32>
    %62 = tpu.matmul %60, %61, %cst_22 {dimension_numbers = #tpu.dot_dimension_numbers<[1], [0], [0], [1], [0, 0, 1, 1], [], []>} : vector<16x16xbf16>, vector<16x8xbf16>, vector<16x8xf32> -> vector<16x8xf32>
    %c0_23 = arith.constant 0 : index
    %c8 = arith.constant 8 : index
    %63 = vector.load %arg23[%c0_23, %c8] : memref<16x32xf32, #tpu.memory_space<vmem>>, vector<16x8xf32>
    tpu.vector_store %arg23[%c0_23, %c8], %62 {strides = array<i32>} : memref<16x32xf32, #tpu.memory_space<vmem>>, vector<16x8xf32>,
    %64 = vector.extract_strided_slice %8 {offsets = [0, 2], sizes = [16, 1], strides = [1, 1]} : vector<16x4xf32> to vector<16x1xf32>
    %65 = vector.extract_strided_slice %11 {offsets = [2, 0], sizes = [1, 16], strides = [1, 1]} : vector<4x16xf32> to vector<1x16xf32>
    %66 = vector.broadcast %64 : vector<16x1xf32> to vector<16x16xf32>
    %67 = vector.broadcast %65 : vector<1x16xf32> to vector<16x16xf32>
    %68 = arith.addf %66, %67 : vector<16x16xf32>
    %cst_24 = arith.constant 0.000000e+00 : f32
    %69 = vector.broadcast %cst_24 : f32 to vector<16x16xf32>
    %70 = arith.cmpf ogt, %68, %69 : vector<16x16xf32>
    %cst_25 = arith.constant 2.000000e-01 : f32
    %71 = vector.broadcast %cst_25 : f32 to vector<16x16xf32>
    %72 = arith.mulf %71, %68 : vector<16x16xf32>
    %73 = arith.select %70, %68, %72 : vector<16x16xi1>, vector<16x16xf32>
    %74 = arith.addf %73, %1 : vector<16x16xf32>
    %cst_26 = arith.constant dense<0xFF800000> : vector<16xf32>
    %75 = vector.multi_reduction <maximumf>, %74, %cst_26 [1] : vector<16x16xf32> to vector<16xf32>
    %76 = vector.shape_cast %75 : vector<16xf32> to vector<16x1xf32>
    %77 = vector.broadcast %76 : vector<16x1xf32> to vector<16x16xf32>
    %78 = arith.subf %74, %77 : vector<16x16xf32>
    %79 = math.exp %78 : vector<16x16xf32>
    %cst_27 = arith.constant dense<0.000000e+00> : vector<16xf32>
    %80 = vector.multi_reduction <add>, %79, %cst_27 [1] : vector<16x16xf32> to vector<16xf32>
    %81 = vector.shape_cast %80 : vector<16xf32> to vector<16x1xf32>
    %82 = tpu.reciprocal %81 {approx = true} : vector<16x1xf32> -> vector<16x1xf32>
    %83 = vector.broadcast %82 : vector<16x1xf32> to vector<16x16xf32>
    %84 = arith.mulf %79, %83 : vector<16x16xf32>
    %85 = vector.extract_strided_slice %5 {offsets = [0, 16], sizes = [16, 8], strides = [1, 1]} : vector<16x32xf32> to vector<16x8xf32>
    %86 = arith.truncf %84 : vector<16x16xf32> to vector<16x16xbf16>
    %87 = arith.truncf %85 : vector<16x8xf32> to vector<16x8xbf16>
    %cst_28 = arith.constant dense<0.000000e+00> : vector<16x8xf32>
    %88 = tpu.matmul %86, %87, %cst_28 {dimension_numbers = #tpu.dot_dimension_numbers<[1], [0], [0], [1], [0, 0, 1, 1], [], []>} : vector<16x16xbf16>, vector<16x8xbf16>, vector<16x8xf32> -> vector<16x8xf32>
    %c0_29 = arith.constant 0 : index
    %c16 = arith.constant 16 : index
    %89 = vector.load %arg23[%c0_29, %c16] : memref<16x32xf32, #tpu.memory_space<vmem>>, vector<16x8xf32>
    tpu.vector_store %arg23[%c0_29, %c16], %88 {strides = array<i32>} : memref<16x32xf32, #tpu.memory_space<vmem>>, vector<16x8xf32>,
    %90 = vector.extract_strided_slice %8 {offsets = [0, 3], sizes = [16, 1], strides = [1, 1]} : vector<16x4xf32> to vector<16x1xf32>
    %91 = vector.extract_strided_slice %11 {offsets = [3, 0], sizes = [1, 16], strides = [1, 1]} : vector<4x16xf32> to vector<1x16xf32>
    %92 = vector.broadcast %90 : vector<16x1xf32> to vector<16x16xf32>
    %93 = vector.broadcast %91 : vector<1x16xf32> to vector<16x16xf32>
    %94 = arith.addf %92, %93 : vector<16x16xf32>
    %cst_30 = arith.constant 0.000000e+00 : f32
    %95 = vector.broadcast %cst_30 : f32 to vector<16x16xf32>
    %96 = arith.cmpf ogt, %94, %95 : vector<16x16xf32>
    %cst_31 = arith.constant 2.000000e-01 : f32
    %97 = vector.broadcast %cst_31 : f32 to vector<16x16xf32>
    %98 = arith.mulf %97, %94 : vector<16x16xf32>
    %99 = arith.select %96, %94, %98 : vector<16x16xi1>, vector<16x16xf32>
    %100 = arith.addf %99, %1 : vector<16x16xf32>
    %cst_32 = arith.constant dense<0xFF800000> : vector<16xf32>
    %101 = vector.multi_reduction <maximumf>, %100, %cst_32 [1] : vector<16x16xf32> to vector<16xf32>
    %102 = vector.shape_cast %101 : vector<16xf32> to vector<16x1xf32>
    %103 = vector.broadcast %102 : vector<16x1xf32> to vector<16x16xf32>
    %104 = arith.subf %100, %103 : vector<16x16xf32>
    %105 = math.exp %104 : vector<16x16xf32>
    %cst_33 = arith.constant dense<0.000000e+00> : vector<16xf32>
    %106 = vector.multi_reduction <add>, %105, %cst_33 [1] : vector<16x16xf32> to vector<16xf32>
    %107 = vector.shape_cast %106 : vector<16xf32> to vector<16x1xf32>
    %108 = tpu.reciprocal %107 {approx = true} : vector<16x1xf32> -> vector<16x1xf32>
    %109 = vector.broadcast %108 : vector<16x1xf32> to vector<16x16xf32>
    %110 = arith.mulf %105, %109 : vector<16x16xf32>
    %111 = vector.extract_strided_slice %5 {offsets = [0, 24], sizes = [16, 8], strides = [1, 1]} : vector<16x32xf32> to vector<16x8xf32>
    %112 = arith.truncf %110 : vector<16x16xf32> to vector<16x16xbf16>
    %113 = arith.truncf %111 : vector<16x8xf32> to vector<16x8xbf16>
    %cst_34 = arith.constant dense<0.000000e+00> : vector<16x8xf32>
    %114 = tpu.matmul %112, %113, %cst_34 {dimension_numbers = #tpu.dot_dimension_numbers<[1], [0], [0], [1], [0, 0, 1, 1], [], []>} : vector<16x16xbf16>, vector<16x8xbf16>, vector<16x8xf32> -> vector<16x8xf32>
    %c0_35 = arith.constant 0 : index
    %c24 = arith.constant 24 : index
    %115 = vector.load %arg23[%c0_35, %c24] : memref<16x32xf32, #tpu.memory_space<vmem>>, vector<16x8xf32>
    tpu.vector_store %arg23[%c0_35, %c24], %114 {strides = array<i32>} : memref<16x32xf32, #tpu.memory_space<vmem>>, vector<16x8xf32>,
    %c0_36 = arith.constant 0 : index
    %c0_37 = arith.constant 0 : index
    %116 = vector.load %arg23[%c0_36, %c0_37] : memref<16x32xf32, #tpu.memory_space<vmem>>, vector<16x32xf32>
    %c0_38 = arith.constant 0 : index
    %c0_39 = arith.constant 0 : index
    %117 = vector.load %arg5[%c0_38, %c0_39] : memref<1x32xf32, #tpu.memory_space<vmem>>, vector<1x32xf32>
    %118 = vector.broadcast %117 : vector<1x32xf32> to vector<16x32xf32>
    %119 = arith.addf %116, %118 : vector<16x32xf32>
    %cst_40 = arith.constant 0.000000e+00 : f32
    %120 = vector.broadcast %cst_40 : f32 to vector<16x32xf32>
    %121 = arith.cmpf ogt, %119, %120 : vector<16x32xf32>
    %cst_41 = arith.constant 0.000000e+00 : f32
    %122 = vector.broadcast %cst_41 : f32 to vector<16x32xf32>
    %123 = arith.minimumf %119, %122 : vector<16x32xf32>
    %124 = math.exp %123 : vector<16x32xf32>
    %cst_42 = arith.constant 1.000000e+00 : f32
    %125 = vector.broadcast %cst_42 : f32 to vector<16x32xf32>
    %126 = arith.subf %124, %125 : vector<16x32xf32>
    %127 = arith.select %121, %119, %126 : vector<16x32xi1>, vector<16x32xf32>
    %c0_43 = arith.constant 0 : index
    %c0_44 = arith.constant 0 : index
    %128 = vector.load %arg6[%c0_43, %c0_44] : memref<32x96xbf16, #tpu.memory_space<vmem>>, vector<32x96xbf16>
    %129 = arith.truncf %127 : vector<16x32xf32> to vector<16x32xbf16>
    %cst_45 = arith.constant dense<0.000000e+00> : vector<16x96xf32>
    %130 = tpu.matmul %129, %128, %cst_45 {dimension_numbers = #tpu.dot_dimension_numbers<[1], [0], [0], [1], [0, 0, 1, 1], [], []>} : vector<16x32xbf16>, vector<32x96xbf16>, vector<16x96xf32> -> vector<16x96xf32>
    %c0_46 = arith.constant 0 : index
    %c0_47 = arith.constant 0 : index
    %131 = vector.load %arg7[%c0_46, %c0_47] : memref<1x96xf32, #tpu.memory_space<vmem>>, vector<1x96xf32>
    %132 = vector.broadcast %131 : vector<1x96xf32> to vector<16x96xf32>
    %133 = arith.addf %130, %132 : vector<16x96xf32>
    %134 = vector.extract_strided_slice %133 {offsets = [0, 0], sizes = [16, 32], strides = [1, 1]} : vector<16x96xf32> to vector<16x32xf32>
    %135 = vector.extract_strided_slice %133 {offsets = [0, 32], sizes = [16, 32], strides = [1, 1]} : vector<16x96xf32> to vector<16x32xf32>
    %136 = vector.extract_strided_slice %133 {offsets = [0, 64], sizes = [16, 32], strides = [1, 1]} : vector<16x96xf32> to vector<16x32xf32>
    %137 = vector.extract_strided_slice %134 {offsets = [0, 0], sizes = [16, 8], strides = [1, 1]} : vector<16x32xf32> to vector<16x8xf32>
    %cst_48 = arith.constant 0.353553385 : f32
    %138 = vector.broadcast %cst_48 : f32 to vector<16x8xf32>
    %139 = arith.mulf %137, %138 : vector<16x8xf32>
    %140 = vector.extract_strided_slice %135 {offsets = [0, 0], sizes = [16, 8], strides = [1, 1]} : vector<16x32xf32> to vector<16x8xf32>
    %141 = arith.truncf %139 : vector<16x8xf32> to vector<16x8xbf16>
    %142 = arith.truncf %140 : vector<16x8xf32> to vector<16x8xbf16>
    %cst_49 = arith.constant dense<0.000000e+00> : vector<16x16xf32>
    %143 = tpu.matmul %141, %142, %cst_49 {dimension_numbers = #tpu.dot_dimension_numbers<[1], [1], [0], [0], [0, 0, 1, 0], [], []>} : vector<16x8xbf16>, vector<16x8xbf16>, vector<16x16xf32> -> vector<16x16xf32>
    %cst_50 = arith.constant dense<0xFF800000> : vector<16xf32>
    %144 = vector.multi_reduction <maximumf>, %143, %cst_50 [1] : vector<16x16xf32> to vector<16xf32>
    %145 = vector.shape_cast %144 : vector<16xf32> to vector<16x1xf32>
    %146 = vector.broadcast %145 : vector<16x1xf32> to vector<16x16xf32>
    %147 = arith.subf %143, %146 : vector<16x16xf32>
    %148 = math.exp %147 : vector<16x16xf32>
    %cst_51 = arith.constant dense<0.000000e+00> : vector<16xf32>
    %149 = vector.multi_reduction <add>, %148, %cst_51 [1] : vector<16x16xf32> to vector<16xf32>
    %150 = vector.shape_cast %149 : vector<16xf32> to vector<16x1xf32>
    %151 = tpu.reciprocal %150 {approx = true} : vector<16x1xf32> -> vector<16x1xf32>
    %152 = vector.broadcast %151 : vector<16x1xf32> to vector<16x16xf32>
    %153 = arith.mulf %148, %152 : vector<16x16xf32>
    %154 = vector.extract_strided_slice %136 {offsets = [0, 0], sizes = [16, 8], strides = [1, 1]} : vector<16x32xf32> to vector<16x8xf32>
    %155 = arith.truncf %153 : vector<16x16xf32> to vector<16x16xbf16>
    %156 = arith.truncf %154 : vector<16x8xf32> to vector<16x8xbf16>
    %cst_52 = arith.constant dense<0.000000e+00> : vector<16x8xf32>
    %157 = tpu.matmul %155, %156, %cst_52 {dimension_numbers = #tpu.dot_dimension_numbers<[1], [0], [0], [1], [0, 0, 1, 1], [], []>} : vector<16x16xbf16>, vector<16x8xbf16>, vector<16x8xf32> -> vector<16x8xf32>
    %c0_53 = arith.constant 0 : index
    %c0_54 = arith.constant 0 : index
    %158 = vector.load %arg24[%c0_53, %c0_54] : memref<16x32xf32, #tpu.memory_space<vmem>>, vector<16x8xf32>
    tpu.vector_store %arg24[%c0_53, %c0_54], %157 {strides = array<i32>} : memref<16x32xf32, #tpu.memory_space<vmem>>, vector<16x8xf32>,
    %159 = vector.extract_strided_slice %134 {offsets = [0, 8], sizes = [16, 8], strides = [1, 1]} : vector<16x32xf32> to vector<16x8xf32>
    %cst_55 = arith.constant 0.353553385 : f32
    %160 = vector.broadcast %cst_55 : f32 to vector<16x8xf32>
    %161 = arith.mulf %159, %160 : vector<16x8xf32>
    %162 = vector.extract_strided_slice %135 {offsets = [0, 8], sizes = [16, 8], strides = [1, 1]} : vector<16x32xf32> to vector<16x8xf32>
    %163 = arith.truncf %161 : vector<16x8xf32> to vector<16x8xbf16>
    %164 = arith.truncf %162 : vector<16x8xf32> to vector<16x8xbf16>
    %cst_56 = arith.constant dense<0.000000e+00> : vector<16x16xf32>
    %165 = tpu.matmul %163, %164, %cst_56 {dimension_numbers = #tpu.dot_dimension_numbers<[1], [1], [0], [0], [0, 0, 1, 0], [], []>} : vector<16x8xbf16>, vector<16x8xbf16>, vector<16x16xf32> -> vector<16x16xf32>
    %cst_57 = arith.constant dense<0xFF800000> : vector<16xf32>
    %166 = vector.multi_reduction <maximumf>, %165, %cst_57 [1] : vector<16x16xf32> to vector<16xf32>
    %167 = vector.shape_cast %166 : vector<16xf32> to vector<16x1xf32>
    %168 = vector.broadcast %167 : vector<16x1xf32> to vector<16x16xf32>
    %169 = arith.subf %165, %168 : vector<16x16xf32>
    %170 = math.exp %169 : vector<16x16xf32>
    %cst_58 = arith.constant dense<0.000000e+00> : vector<16xf32>
    %171 = vector.multi_reduction <add>, %170, %cst_58 [1] : vector<16x16xf32> to vector<16xf32>
    %172 = vector.shape_cast %171 : vector<16xf32> to vector<16x1xf32>
    %173 = tpu.reciprocal %172 {approx = true} : vector<16x1xf32> -> vector<16x1xf32>
    %174 = vector.broadcast %173 : vector<16x1xf32> to vector<16x16xf32>
    %175 = arith.mulf %170, %174 : vector<16x16xf32>
    %176 = vector.extract_strided_slice %136 {offsets = [0, 8], sizes = [16, 8], strides = [1, 1]} : vector<16x32xf32> to vector<16x8xf32>
    %177 = arith.truncf %175 : vector<16x16xf32> to vector<16x16xbf16>
    %178 = arith.truncf %176 : vector<16x8xf32> to vector<16x8xbf16>
    %cst_59 = arith.constant dense<0.000000e+00> : vector<16x8xf32>
    %179 = tpu.matmul %177, %178, %cst_59 {dimension_numbers = #tpu.dot_dimension_numbers<[1], [0], [0], [1], [0, 0, 1, 1], [], []>} : vector<16x16xbf16>, vector<16x8xbf16>, vector<16x8xf32> -> vector<16x8xf32>
    %c0_60 = arith.constant 0 : index
    %c8_61 = arith.constant 8 : index
    %180 = vector.load %arg24[%c0_60, %c8_61] : memref<16x32xf32, #tpu.memory_space<vmem>>, vector<16x8xf32>
    tpu.vector_store %arg24[%c0_60, %c8_61], %179 {strides = array<i32>} : memref<16x32xf32, #tpu.memory_space<vmem>>, vector<16x8xf32>,
    %181 = vector.extract_strided_slice %134 {offsets = [0, 16], sizes = [16, 8], strides = [1, 1]} : vector<16x32xf32> to vector<16x8xf32>
    %cst_62 = arith.constant 0.353553385 : f32
    %182 = vector.broadcast %cst_62 : f32 to vector<16x8xf32>
    %183 = arith.mulf %181, %182 : vector<16x8xf32>
    %184 = vector.extract_strided_slice %135 {offsets = [0, 16], sizes = [16, 8], strides = [1, 1]} : vector<16x32xf32> to vector<16x8xf32>
    %185 = arith.truncf %183 : vector<16x8xf32> to vector<16x8xbf16>
    %186 = arith.truncf %184 : vector<16x8xf32> to vector<16x8xbf16>
    %cst_63 = arith.constant dense<0.000000e+00> : vector<16x16xf32>
    %187 = tpu.matmul %185, %186, %cst_63 {dimension_numbers = #tpu.dot_dimension_numbers<[1], [1], [0], [0], [0, 0, 1, 0], [], []>} : vector<16x8xbf16>, vector<16x8xbf16>, vector<16x16xf32> -> vector<16x16xf32>
    %cst_64 = arith.constant dense<0xFF800000> : vector<16xf32>
    %188 = vector.multi_reduction <maximumf>, %187, %cst_64 [1] : vector<16x16xf32> to vector<16xf32>
    %189 = vector.shape_cast %188 : vector<16xf32> to vector<16x1xf32>
    %190 = vector.broadcast %189 : vector<16x1xf32> to vector<16x16xf32>
    %191 = arith.subf %187, %190 : vector<16x16xf32>
    %192 = math.exp %191 : vector<16x16xf32>
    %cst_65 = arith.constant dense<0.000000e+00> : vector<16xf32>
    %193 = vector.multi_reduction <add>, %192, %cst_65 [1] : vector<16x16xf32> to vector<16xf32>
    %194 = vector.shape_cast %193 : vector<16xf32> to vector<16x1xf32>
    %195 = tpu.reciprocal %194 {approx = true} : vector<16x1xf32> -> vector<16x1xf32>
    %196 = vector.broadcast %195 : vector<16x1xf32> to vector<16x16xf32>
    %197 = arith.mulf %192, %196 : vector<16x16xf32>
    %198 = vector.extract_strided_slice %136 {offsets = [0, 16], sizes = [16, 8], strides = [1, 1]} : vector<16x32xf32> to vector<16x8xf32>
    %199 = arith.truncf %197 : vector<16x16xf32> to vector<16x16xbf16>
    %200 = arith.truncf %198 : vector<16x8xf32> to vector<16x8xbf16>
    %cst_66 = arith.constant dense<0.000000e+00> : vector<16x8xf32>
    %201 = tpu.matmul %199, %200, %cst_66 {dimension_numbers = #tpu.dot_dimension_numbers<[1], [0], [0], [1], [0, 0, 1, 1], [], []>} : vector<16x16xbf16>, vector<16x8xbf16>, vector<16x8xf32> -> vector<16x8xf32>
    %c0_67 = arith.constant 0 : index
    %c16_68 = arith.constant 16 : index
    %202 = vector.load %arg24[%c0_67, %c16_68] : memref<16x32xf32, #tpu.memory_space<vmem>>, vector<16x8xf32>
    tpu.vector_store %arg24[%c0_67, %c16_68], %201 {strides = array<i32>} : memref<16x32xf32, #tpu.memory_space<vmem>>, vector<16x8xf32>,
    %203 = vector.extract_strided_slice %134 {offsets = [0, 24], sizes = [16, 8], strides = [1, 1]} : vector<16x32xf32> to vector<16x8xf32>
    %cst_69 = arith.constant 0.353553385 : f32
    %204 = vector.broadcast %cst_69 : f32 to vector<16x8xf32>
    %205 = arith.mulf %203, %204 : vector<16x8xf32>
    %206 = vector.extract_strided_slice %135 {offsets = [0, 24], sizes = [16, 8], strides = [1, 1]} : vector<16x32xf32> to vector<16x8xf32>
    %207 = arith.truncf %205 : vector<16x8xf32> to vector<16x8xbf16>
    %208 = arith.truncf %206 : vector<16x8xf32> to vector<16x8xbf16>
    %cst_70 = arith.constant dense<0.000000e+00> : vector<16x16xf32>
    %209 = tpu.matmul %207, %208, %cst_70 {dimension_numbers = #tpu.dot_dimension_numbers<[1], [1], [0], [0], [0, 0, 1, 0], [], []>} : vector<16x8xbf16>, vector<16x8xbf16>, vector<16x16xf32> -> vector<16x16xf32>
    %cst_71 = arith.constant dense<0xFF800000> : vector<16xf32>
    %210 = vector.multi_reduction <maximumf>, %209, %cst_71 [1] : vector<16x16xf32> to vector<16xf32>
    %211 = vector.shape_cast %210 : vector<16xf32> to vector<16x1xf32>
    %212 = vector.broadcast %211 : vector<16x1xf32> to vector<16x16xf32>
    %213 = arith.subf %209, %212 : vector<16x16xf32>
    %214 = math.exp %213 : vector<16x16xf32>
    %cst_72 = arith.constant dense<0.000000e+00> : vector<16xf32>
    %215 = vector.multi_reduction <add>, %214, %cst_72 [1] : vector<16x16xf32> to vector<16xf32>
    %216 = vector.shape_cast %215 : vector<16xf32> to vector<16x1xf32>
    %217 = tpu.reciprocal %216 {approx = true} : vector<16x1xf32> -> vector<16x1xf32>
    %218 = vector.broadcast %217 : vector<16x1xf32> to vector<16x16xf32>
    %219 = arith.mulf %214, %218 : vector<16x16xf32>
    %220 = vector.extract_strided_slice %136 {offsets = [0, 24], sizes = [16, 8], strides = [1, 1]} : vector<16x32xf32> to vector<16x8xf32>
    %221 = arith.truncf %219 : vector<16x16xf32> to vector<16x16xbf16>
    %222 = arith.truncf %220 : vector<16x8xf32> to vector<16x8xbf16>
    %cst_73 = arith.constant dense<0.000000e+00> : vector<16x8xf32>
    %223 = tpu.matmul %221, %222, %cst_73 {dimension_numbers = #tpu.dot_dimension_numbers<[1], [0], [0], [1], [0, 0, 1, 1], [], []>} : vector<16x16xbf16>, vector<16x8xbf16>, vector<16x8xf32> -> vector<16x8xf32>
    %c0_74 = arith.constant 0 : index
    %c24_75 = arith.constant 24 : index
    %224 = vector.load %arg24[%c0_74, %c24_75] : memref<16x32xf32, #tpu.memory_space<vmem>>, vector<16x8xf32>
    tpu.vector_store %arg24[%c0_74, %c24_75], %223 {strides = array<i32>} : memref<16x32xf32, #tpu.memory_space<vmem>>, vector<16x8xf32>,
    %c0_76 = arith.constant 0 : index
    %c0_77 = arith.constant 0 : index
    %225 = vector.load %arg24[%c0_76, %c0_77] : memref<16x32xf32, #tpu.memory_space<vmem>>, vector<16x32xf32>
    %c0_78 = arith.constant 0 : index
    %c0_79 = arith.constant 0 : index
    %226 = vector.load %arg8[%c0_78, %c0_79] : memref<32x32xbf16, #tpu.memory_space<vmem>>, vector<32x32xbf16>
    %227 = arith.truncf %225 : vector<16x32xf32> to vector<16x32xbf16>
    %cst_80 = arith.constant dense<0.000000e+00> : vector<16x32xf32>
    %228 = tpu.matmul %227, %226, %cst_80 {dimension_numbers = #tpu.dot_dimension_numbers<[1], [0], [0], [1], [0, 0, 1, 1], [], []>} : vector<16x32xbf16>, vector<32x32xbf16>, vector<16x32xf32> -> vector<16x32xf32>
    %c0_81 = arith.constant 0 : index
    %c0_82 = arith.constant 0 : index
    %229 = vector.load %arg9[%c0_81, %c0_82] : memref<1x32xf32, #tpu.memory_space<vmem>>, vector<1x32xf32>
    %230 = vector.broadcast %229 : vector<1x32xf32> to vector<16x32xf32>
    %231 = arith.addf %228, %230 : vector<16x32xf32>
    %232 = arith.addf %127, %231 : vector<16x32xf32>
    %c0_83 = arith.constant 0 : index
    %c0_84 = arith.constant 0 : index
    %233 = vector.load %arg14[%c0_83, %c0_84] : memref<1x32xf32, #tpu.memory_space<vmem>>, vector<1x32xf32>
    %c0_85 = arith.constant 0 : index
    %c0_86 = arith.constant 0 : index
    %234 = vector.load %arg15[%c0_85, %c0_86] : memref<1x32xf32, #tpu.memory_space<vmem>>, vector<1x32xf32>
    %cst_87 = arith.constant dense<0.000000e+00> : vector<16xf32>
    %235 = vector.multi_reduction <add>, %232, %cst_87 [1] : vector<16x32xf32> to vector<16xf32>
    %236 = vector.shape_cast %235 : vector<16xf32> to vector<16x1xf32>
    %cst_88 = arith.constant 3.200000e+01 : f32
    %237 = vector.broadcast %cst_88 : f32 to vector<16x1xf32>
    %238 = arith.divf %236, %237 : vector<16x1xf32>
    %239 = vector.broadcast %238 : vector<16x1xf32> to vector<16x32xf32>
    %240 = arith.subf %232, %239 : vector<16x32xf32>
    %241 = vector.broadcast %238 : vector<16x1xf32> to vector<16x32xf32>
    %242 = arith.subf %232, %241 : vector<16x32xf32>
    %243 = arith.mulf %240, %242 : vector<16x32xf32>
    %cst_89 = arith.constant dense<0.000000e+00> : vector<16xf32>
    %244 = vector.multi_reduction <add>, %243, %cst_89 [1] : vector<16x32xf32> to vector<16xf32>
    %245 = vector.shape_cast %244 : vector<16xf32> to vector<16x1xf32>
    %cst_90 = arith.constant 3.200000e+01 : f32
    %246 = vector.broadcast %cst_90 : f32 to vector<16x1xf32>
    %247 = arith.divf %245, %246 : vector<16x1xf32>
    %248 = vector.broadcast %238 : vector<16x1xf32> to vector<16x32xf32>
    %249 = arith.subf %232, %248 : vector<16x32xf32>
    %cst_91 = arith.constant 9.99999974E-6 : f32
    %250 = vector.broadcast %cst_91 : f32 to vector<16x1xf32>
    %251 = arith.addf %247, %250 : vector<16x1xf32>
    %252 = math.rsqrt %251 : vector<16x1xf32>
    %253 = vector.broadcast %252 : vector<16x1xf32> to vector<16x32xf32>
    %254 = arith.mulf %249, %253 : vector<16x32xf32>
    %255 = vector.broadcast %233 : vector<1x32xf32> to vector<16x32xf32>
    %256 = arith.mulf %254, %255 : vector<16x32xf32>
    %257 = vector.broadcast %234 : vector<1x32xf32> to vector<16x32xf32>
    %258 = arith.addf %256, %257 : vector<16x32xf32>
    %c0_92 = arith.constant 0 : index
    %c0_93 = arith.constant 0 : index
    %259 = vector.load %arg10[%c0_92, %c0_93] : memref<32x2048xbf16, #tpu.memory_space<vmem>>, vector<32x2048xbf16>
    %260 = arith.truncf %258 : vector<16x32xf32> to vector<16x32xbf16>
    %cst_94 = arith.constant dense<0.000000e+00> : vector<16x2048xf32>
    %261 = tpu.matmul %260, %259, %cst_94 {dimension_numbers = #tpu.dot_dimension_numbers<[1], [0], [0], [1], [0, 0, 1, 1], [], []>} : vector<16x32xbf16>, vector<32x2048xbf16>, vector<16x2048xf32> -> vector<16x2048xf32>
    %c0_95 = arith.constant 0 : index
    %c0_96 = arith.constant 0 : index
    %262 = vector.load %arg11[%c0_95, %c0_96] : memref<1x2048xf32, #tpu.memory_space<vmem>>, vector<1x2048xf32>
    %263 = vector.broadcast %262 : vector<1x2048xf32> to vector<16x2048xf32>
    %264 = arith.addf %261, %263 : vector<16x2048xf32>
    %cst_97 = arith.constant 0.000000e+00 : f32
    %265 = vector.broadcast %cst_97 : f32 to vector<16x2048xf32>
    %266 = arith.maximumf %264, %265 : vector<16x2048xf32>
    %c0_98 = arith.constant 0 : index
    %c0_99 = arith.constant 0 : index
    %267 = vector.load %arg12[%c0_98, %c0_99] : memref<2048x32xbf16, #tpu.memory_space<vmem>>, vector<2048x32xbf16>
    %268 = arith.truncf %266 : vector<16x2048xf32> to vector<16x2048xbf16>
    %cst_100 = arith.constant dense<0.000000e+00> : vector<16x32xf32>
    %269 = tpu.matmul %268, %267, %cst_100 {dimension_numbers = #tpu.dot_dimension_numbers<[1], [0], [0], [1], [0, 0, 1, 1], [], []>} : vector<16x2048xbf16>, vector<2048x32xbf16>, vector<16x32xf32> -> vector<16x32xf32>
    %270 = arith.addf %258, %269 : vector<16x32xf32>
    %c0_101 = arith.constant 0 : index
    %c0_102 = arith.constant 0 : index
    %271 = vector.load %arg13[%c0_101, %c0_102] : memref<1x32xf32, #tpu.memory_space<vmem>>, vector<1x32xf32>
    %272 = vector.broadcast %271 : vector<1x32xf32> to vector<16x32xf32>
    %273 = arith.addf %270, %272 : vector<16x32xf32>
    %c0_103 = arith.constant 0 : index
    %c0_104 = arith.constant 0 : index
    %274 = vector.load %arg16[%c0_103, %c0_104] : memref<1x32xf32, #tpu.memory_space<vmem>>, vector<1x32xf32>
    %c0_105 = arith.constant 0 : index
    %c0_106 = arith.constant 0 : index
    %275 = vector.load %arg17[%c0_105, %c0_106] : memref<1x32xf32, #tpu.memory_space<vmem>>, vector<1x32xf32>
    %cst_107 = arith.constant dense<0.000000e+00> : vector<16xf32>
    %276 = vector.multi_reduction <add>, %273, %cst_107 [1] : vector<16x32xf32> to vector<16xf32>
    %277 = vector.shape_cast %276 : vector<16xf32> to vector<16x1xf32>
    %cst_108 = arith.constant 3.200000e+01 : f32
    %278 = vector.broadcast %cst_108 : f32 to vector<16x1xf32>
    %279 = arith.divf %277, %278 : vector<16x1xf32>
    %280 = vector.broadcast %279 : vector<16x1xf32> to vector<16x32xf32>
    %281 = arith.subf %273, %280 : vector<16x32xf32>
    %282 = vector.broadcast %279 : vector<16x1xf32> to vector<16x32xf32>
    %283 = arith.subf %273, %282 : vector<16x32xf32>
    %284 = arith.mulf %281, %283 : vector<16x32xf32>
    %cst_109 = arith.constant dense<0.000000e+00> : vector<16xf32>
    %285 = vector.multi_reduction <add>, %284, %cst_109 [1] : vector<16x32xf32> to vector<16xf32>
    %286 = vector.shape_cast %285 : vector<16xf32> to vector<16x1xf32>
    %cst_110 = arith.constant 3.200000e+01 : f32
    %287 = vector.broadcast %cst_110 : f32 to vector<16x1xf32>
    %288 = arith.divf %286, %287 : vector<16x1xf32>
    %289 = vector.broadcast %279 : vector<16x1xf32> to vector<16x32xf32>
    %290 = arith.subf %273, %289 : vector<16x32xf32>
    %cst_111 = arith.constant 9.99999974E-6 : f32
    %291 = vector.broadcast %cst_111 : f32 to vector<16x1xf32>
    %292 = arith.addf %288, %291 : vector<16x1xf32>
    %293 = math.rsqrt %292 : vector<16x1xf32>
    %294 = vector.broadcast %293 : vector<16x1xf32> to vector<16x32xf32>
    %295 = arith.mulf %290, %294 : vector<16x32xf32>
    %296 = vector.broadcast %274 : vector<1x32xf32> to vector<16x32xf32>
    %297 = arith.mulf %295, %296 : vector<16x32xf32>
    %298 = vector.broadcast %275 : vector<1x32xf32> to vector<16x32xf32>
    %299 = arith.addf %297, %298 : vector<16x32xf32>
    %c0_112 = arith.constant 0 : index
    %c0_113 = arith.constant 0 : index
    %300 = vector.load %arg18[%c0_112, %c0_113] : memref<32x128xbf16, #tpu.memory_space<vmem>>, vector<32x128xbf16>
    %301 = arith.truncf %299 : vector<16x32xf32> to vector<16x32xbf16>
    %cst_114 = arith.constant dense<0.000000e+00> : vector<16x128xf32>
    %302 = tpu.matmul %301, %300, %cst_114 {dimension_numbers = #tpu.dot_dimension_numbers<[1], [0], [0], [1], [0, 0, 1, 1], [], []>} : vector<16x32xbf16>, vector<32x128xbf16>, vector<16x128xf32> -> vector<16x128xf32>
    %c0_115 = arith.constant 0 : index
    %c0_116 = arith.constant 0 : index
    %303 = vector.load %arg19[%c0_115, %c0_116] : memref<128x1xbf16, #tpu.memory_space<vmem>>, vector<128x1xbf16>
    %304 = arith.truncf %302 : vector<16x128xf32> to vector<16x128xbf16>
    %cst_117 = arith.constant dense<0.000000e+00> : vector<16x1xf32>
    %305 = tpu.matmul %304, %303, %cst_117 {dimension_numbers = #tpu.dot_dimension_numbers<[1], [0], [0], [1], [0, 0, 1, 1], [], []>} : vector<16x128xbf16>, vector<128x1xbf16>, vector<16x1xf32> -> vector<16x1xf32>
    %c0_118 = arith.constant 0 : index
    %c0_119 = arith.constant 0 : index
    %306 = vector.load %arg20[%c0_118, %c0_119] : memref<1x128xbf16, #tpu.memory_space<vmem>>, vector<1x128xbf16>
    %307 = arith.truncf %302 : vector<16x128xf32> to vector<16x128xbf16>
    %cst_120 = arith.constant dense<0.000000e+00> : vector<1x16xf32>
    %308 = tpu.matmul %306, %307, %cst_120 {dimension_numbers = #tpu.dot_dimension_numbers<[1], [1], [0], [0], [0, 0, 1, 0], [], []>} : vector<1x128xbf16>, vector<16x128xbf16>, vector<1x16xf32> -> vector<1x16xf32>
    %309 = vector.broadcast %305 : vector<16x1xf32> to vector<16x16xf32>
    %310 = vector.broadcast %308 : vector<1x16xf32> to vector<16x16xf32>
    %311 = arith.addf %309, %310 : vector<16x16xf32>
    %cst_121 = arith.constant 0.000000e+00 : f32
    %312 = vector.broadcast %cst_121 : f32 to vector<16x16xf32>
    %313 = arith.cmpf ogt, %311, %312 : vector<16x16xf32>
    %cst_122 = arith.constant 2.000000e-01 : f32
    %314 = vector.broadcast %cst_122 : f32 to vector<16x16xf32>
    %315 = arith.mulf %314, %311 : vector<16x16xf32>
    %316 = arith.select %313, %311, %315 : vector<16x16xi1>, vector<16x16xf32>
    %317 = arith.addf %316, %1 : vector<16x16xf32>
    %cst_123 = arith.constant dense<0xFF800000> : vector<16xf32>
    %318 = vector.multi_reduction <maximumf>, %317, %cst_123 [1] : vector<16x16xf32> to vector<16xf32>
    %319 = vector.shape_cast %318 : vector<16xf32> to vector<16x1xf32>
    %320 = vector.broadcast %319 : vector<16x1xf32> to vector<16x16xf32>
    %321 = arith.subf %317, %320 : vector<16x16xf32>
    %322 = math.exp %321 : vector<16x16xf32>
    %cst_124 = arith.constant dense<0.000000e+00> : vector<16xf32>
    %323 = vector.multi_reduction <add>, %322, %cst_124 [1] : vector<16x16xf32> to vector<16xf32>
    %324 = vector.shape_cast %323 : vector<16xf32> to vector<16x1xf32>
    %325 = tpu.reciprocal %324 {approx = true} : vector<16x1xf32> -> vector<16x1xf32>
    %326 = vector.broadcast %325 : vector<16x1xf32> to vector<16x16xf32>
    %327 = arith.mulf %322, %326 : vector<16x16xf32>
    %328 = arith.truncf %327 : vector<16x16xf32> to vector<16x16xbf16>
    %329 = arith.truncf %302 : vector<16x128xf32> to vector<16x128xbf16>
    %cst_125 = arith.constant dense<0.000000e+00> : vector<16x128xf32>
    %330 = tpu.matmul %328, %329, %cst_125 {dimension_numbers = #tpu.dot_dimension_numbers<[1], [0], [0], [1], [0, 0, 1, 1], [], []>} : vector<16x16xbf16>, vector<16x128xbf16>, vector<16x128xf32> -> vector<16x128xf32>
    %c0_126 = arith.constant 0 : index
    %c0_127 = arith.constant 0 : index
    %331 = vector.load %arg21[%c0_126, %c0_127] : memref<1x128xf32, #tpu.memory_space<vmem>>, vector<1x128xf32>
    %332 = vector.broadcast %331 : vector<1x128xf32> to vector<16x128xf32>
    %333 = arith.addf %330, %332 : vector<16x128xf32>
    %c0_128 = arith.constant 0 : index
    %c0_129 = arith.constant 0 : index
    %334 = vector.load %arg22[%c0_128, %c0_129] : memref<16x128xf32, #tpu.memory_space<vmem>>, vector<16x128xf32>
    tpu.vector_store %arg22[%c0_128, %c0_129], %333 {strides = array<i32>} : memref<16x128xf32, #tpu.memory_space<vmem>>, vector<16x128xf32>,
    return
  }
}

</mosaic_0001>

<bundles_post_ra>
// kernel: tpu_custom_call.1
= control target key start
LH: loop header
LB: loop body
LE: loop exit
PB: predicated region body
PF: predicated region fallthrough
CT: control target
= control target key end

     0   :  { %s5731_s0 = inlined_call_operand.vmem [shape: f32[16,12], index: 0, kind: input, shape index: {}]   ;;  %s5732_s1 = inlined_call_operand.vmem [shape: bf16[16,16], index: 1, kind: input, shape index: {}]   ;;  %s5733_s2 = inlined_call_operand.vmem [shape: bf16[12,32], index: 2, kind: input, shape index: {}]   ;;  %s5734_s3 = inlined_call_operand.vmem [shape: bf16[32,4], index: 3, kind: input, shape index: {}]   ;;  %s5735_s4 = inlined_call_operand.vmem [shape: bf16[4,32], index: 4, kind: input, shape index: {}]   ;;  %s5736_s5 = inlined_call_operand.vmem [shape: f32[1,32], index: 5, kind: input, shape index: {}]   ;;  %s5737_s6 = inlined_call_operand.vmem [shape: bf16[32,96], index: 6, kind: input, shape index: {}]   ;;  %s5738_s7 = inlined_call_operand.vmem [shape: f32[1,96], index: 7, kind: input, shape index: {}]   ;;  %s5739_s8 = inlined_call_operand.vmem [shape: bf16[32,32], index: 8, kind: input, shape index: {}]   ;;  %s5740_s9 = inlined_call_operand.vmem [shape: f32[1,32], index: 9, kind: input, shape index: {}]   ;;  %s5741_s10 = inlined_call_operand.vmem [shape: bf16[32,2048], index: 10, kind: input, shape index: {}]   ;;  %s5742_s11 = inlined_call_operand.vmem [shape: f32[1,2048], index: 11, kind: input, shape index: {}]   ;;  %s5743_s12 = inlined_call_operand.vmem [shape: bf16[2048,32], index: 12, kind: input, shape index: {}]   ;;  %s5744_s13 = inlined_call_operand.vmem [shape: f32[1,32], index: 13, kind: input, shape index: {}]   ;;  %s5745_s14 = inlined_call_operand.vmem [shape: f32[1,32], index: 14, kind: input, shape index: {}]   ;;  %s5746_s15 = inlined_call_operand.vmem [shape: f32[1,32], index: 15, kind: input, shape index: {}]   ;;  %s5747_s16 = inlined_call_operand.vmem [shape: f32[1,32], index: 16, kind: input, shape index: {}]   ;;  %s5748_s17 = inlined_call_operand.vmem [shape: f32[1,32], index: 17, kind: input, shape index: {}]   ;;  %s5749_s18 = inlined_call_operand.vmem [shape: bf16[32,128], index: 18, kind: input, shape index: {}]   ;;  %s5750_s19 = inlined_call_operand.vmem [shape: bf16[128,1], index: 19, kind: input, shape index: {}]   ;;  %s5751_s20 = inlined_call_operand.vmem [shape: bf16[1,128], index: 20, kind: input, shape index: {}]   ;;  %s5752_s21 = inlined_call_operand.vmem [shape: f32[1,128], index: 21, kind: input, shape index: {}]   ;;  %s5753_s22 = inlined_call_operand.hbm [shape: f32[16,128], index: 22, kind: output, shape index: {}]  }
   0x1   :  { %5757 = sst [smem:[#allocation7_spill]] %s5731_s0 }
   0x2   :  { %5758 = sst [smem:[#allocation8_spill]] %s5732_s1 }
   0x3   :  { %5759 = sst [smem:[#allocation9_spill]] %s5733_s2 }
   0x4   :  { %5760 = sst [smem:[#allocation10_spill]] %s5734_s3 }
   0x5   :  { %5761 = sst [smem:[#allocation11_spill]] %s5735_s4 }
   0x6   :  { %5762 = sst [smem:[#allocation12_spill]] %s5736_s5 }
   0x7   :  { %5763 = sst [smem:[#allocation13_spill]] %s5737_s6 }
   0x8   :  { %vm91_vm0 = vcmask 1045504   ;;  %v4657_v0 = vmov 0.0   ;;  %s5764_s29 = sld [smem:[#allocation9_spill]]  ;;  %s5765_s0 = sld [smem:[#allocation7_spill]]  ;;  %vm4658_vm1 = vmmov 0   ;;  %vm87_vm2 = vcmask 97280  }
   0x9   :  { %4226 = vmatprep.subr.bf16.mxu1 %v4657_v0  ;;  %4240 = vmatprep.subr.bf16.mxu0 %v4657_v0  ;;  %s5766_s6 = sld [smem:[#allocation10_spill]] }
   0xa   :  { %4228 = vmatprep.mubr.msk.bf16.mxu1 %vm4658_vm1, %v4657_v0  ;;  %4242 = vmatprep.mubr.msk.bf16.mxu0 %vm4658_vm1, %v4657_v0 }
   0xe   :  { %v4404_v1 = vld [vmem:[%s5764_s29] sm:$0x3f]   ;;  %v78_v3 = vld [vmem:[%s5765_s0 + $0x8] sm:$0xff] }
   0xf   :  { %v77_v2 = vld [vmem:[%s5765_s0] sm:$0xff]  ;;  %v93_v4 = vsel %vm91_vm0, %v4404_v1, 0  ;;  %v4406_v7 = vld [vmem:[%s5766_s6 + $0x8] sm:$0xff]  }
  0x10   :  { %v81_v5 = vpack.c.bf16 %v78_v3, %v77_v2  ;;  %v4405_v6 = vld [vmem:[%s5766_s6] sm:$0xff]   ;;  %4227 = vmatpush3.bf16.msra.mxu1 %v93_v4 }
  0x11   :  { %4232 = vmatprep.subr.bf16.mxu1 %v4657_v0 }
  0x13   :  { %4229 = vmatmul.mubr.msk.bf16.vlgmr.msra.gmra.mrb[0].mxu1 %vm87_vm2, %v81_v5 }
  0x14   :  { %4233 = vmatpush3.bf16.msra.mxu1 %v4405_v6  ;;  %4236 = vmatprep.mubr.msk.bf16.mxu1 %vm4658_vm1, %v4657_v0 }
  0x15   :  { %4234 = vmatprep.subr.bf16.mxu1 %v4657_v0 }
  0x18   :  { %4235 = vmatpush3.bf16.msra.mxu1 %v4406_v7 }
  0x19   :  { %4246 = vmatprep.subr.bf16.mxu1 %v4657_v0 }
  0x1a   :  { %27 = vsyncpa [#allocation5], 0  ;;  %v4659_v8 = vmov 1   ;;  %v4660_v9 = vmov 0   ;;  %vm153_vm3 = vcmask 261120   ;;  %s5767_s3 = sld [smem:[#allocation11_spill]]  ;;  %v252_v27 = vlaneseq }
  0x1b   :  { %4397 = vset.pattern.permute.xlu1 %v4659_v8  ;;  %4396 = vset.pattern.permute.xlu0 %v4660_v9  ;;  %v4661_v22 = vmov 2   ;;  %v4662_v26 = vmov 3   ;;  %s5768_s30 = sld [smem:[#allocation8_spill]]  ;;  %vm266_vm6 = vcmask 130048   ;;  %s4663_s4 = smov 120   ;;  %vm334_vm13 = vcmask 64512  }
  0x1c   :  { %v4842_v28 = vshrl.u32 %v252_v27, 7  ;;  %s4664_s0 = smov 104   ;;  %s4665_s23 = smov 112   ;;  %vm438_vm14 = vcmask 130112   ;;  %vm541_vm15 = vcmask 195712   ;;  %vm644_vm0 = vcmask 261312  }
  0x1d   :  { %s5769_s24 = sld [smem:[#allocation13_spill]]  ;;  %s4666_s26 = smov 8  }
  0x1e   :  { %v4845_v29 = vsub.s32 1, %v4842_v28  ;;  %v4848_v30 = vsub.s32 0, %v4842_v28  ;;  %v4860_v43 = vsub.s32 2, %v4842_v28  ;;  %v4870_v58 = vsub.s32 3, %v4842_v28  ;;  %s4667_s2 = smov 16   ;;  %s4668_s27 = smov 24  }
  0x1f   :  { %s5770_s29 = sld [smem:[#allocation12_spill]]  ;;  %s4669_s5 = smov 88  }
  0x20   :  { %v198_v16 = vld [vmem:[%s5767_s3] sm:$0x3]  ;;  %s4671_s6 = smov 80   ;;  %s4676_s25 = smov 56  }
  0x21   :  { %v3994_v33 = vld [vmem:[%s5768_s30] sm:$0xff]  }
  0x22   :  { %v4857_v38 = vunpack.c.l.bf16 %v3994_v33  ;;  %v4863_v49 = vunpack.c.h.bf16 %v3994_v33 }
  0xe6   :  { %v129_v10 = vpop.f32.mrb[0].mxu1 }
  0xe7   :  { %v4230_v11 = vpop.f32.mrb[1].mxu1 }
  0xe8   :  { %v132_v12 = vpop.f32.mrb[2].mxu1 }
  0xe9   :  { %v4821_v13 = vpack.c.bf16 %v132_v12, %v129_v10  ;;  %v4231_v14 = vpop.f32.mrb[3].mxu1 }
  0xeb   :  { %4237 = vmatmul.mubr.msk.bf16.vlgmr.msra.gmra.mrb[4].mxu1 %vm153_vm3, %v4821_v13  ;;  %v155_v15 = vsel %vm153_vm3, %v4821_v13, 0 }
  0xec   :  { %4247 = vmatpush3.bf16.msra.mxu1 %v4821_v13  ;;  %4241 = vmatpush3.bf16.xpose.msra.mxu0 %v155_v15 }
  0xed   :  { %4252 = vmatprep.subr.bf16.mxu0 %v4657_v0  ;;  %4248 = vmatprep.mubr.msk.bf16.mxu1 %vm4658_vm1, %v4657_v0 }
  0xee   :  { %4258 = vmatprep.subr.bf16.mxu1 %v4657_v0 }
  0xf3   :  { %4243 = vmatmul.mubr.msk.bf16.vlgmr.msra.gmra.mrb[0].mxu0 %vm153_vm3, %v198_v16 }
  0xf4   :  { %4254 = vmatprep.mubr.msk.bf16.mxu0 %vm4658_vm1, %v4657_v0 }
 0x1be   :  { %v191_v17 = vpop.f32.mrb[4].mxu1 }
 0x1bf   :  { %338 = vperm.xlu1 %4397, %v191_v17   ;;  %244 = vperm.xlu0 %4396, %v191_v17   ;;  %v4238_v18 = vpop.f32.mrb[5].mxu1 }
 0x1c0   :  { %v194_v19 = vpop.f32.mrb[6].mxu1 }
 0x1c1   :  { %v4239_v20 = vpop.f32.mrb[7].mxu1 }
 0x1c3   :  { %342 = vperm.xlu1 %4397, %v194_v19   ;;  %249 = vperm.xlu0 %4396, %v194_v19  }
 0x1c6   :  { %v4838_v21 = vpop.f32.mrb[0].mxu0 }
 0x1c7   :  { %4399 = vset.pattern.permute.xlu1 %v4661_v22  ;;  %4398 = vset.pattern.permute.xlu0 %v4661_v22  ;;  %v4244_v23 = vpop.f32.mrb[1].mxu0  ;;  %v348_v31 = vrot.slane %v4838_v21, %v4845_v29  ;;  %v255_v32 = vrot.slane %v4838_v21, %v4848_v30  ;;  %v452_v53 = vrot.slane %v4838_v21, %v4860_v43 }
 0x1c8   :  { %446 = vperm.xlu1 %4399, %v194_v19   ;;  %442 = vperm.xlu0 %4398, %v191_v17   ;;  %v239_v24 = vpop.f32.mrb[2].mxu0  ;;  %v555_v5 = vrot.slane %v4838_v21, %v4870_v58 }
 0x1c9   :  { %v4245_v25 = vpop.f32.mrb[3].mxu0 }
 0x1cc   :  { %4400 = vset.pattern.permute.xlu1 %v4662_v26  ;;  %4401 = vset.pattern.permute.xlu0 %v4662_v26 }
 0x1cd   :  { %545 = vperm.xlu1 %4400, %v191_v17   ;;  %549 = vperm.xlu0 %4401, %v194_v19  }
 0x1d1   :  { %4402 = vset.pattern.permute.xlu1 %v4660_v9  ;;  %4403 = vset.pattern.permute.xlu0 %v4660_v9 }
 0x23e   :  { %v339_v34 = vpop.permute.xlu1 %338  ;;  %v245_v35 = vpop.permute.xlu0 %244 }
 0x23f   :  { %v349_v36 = vadd.f32 %v348_v31, %v339_v34  ;;  %v256_v37 = vadd.f32 %v255_v32, %v245_v35 }
 0x241   :  { %vm351_vm4 = vcmp.gt.f32.partialorder %v349_v36, 0.0  ;;  %v353_v39 = vmul.f32 0.2, %v349_v36  ;;  %vm258_vm5 = vcmp.gt.f32.partialorder %v256_v37, 0.0  ;;  %v260_v40 = vmul.f32 0.2, %v256_v37 }
 0x242   :  { %v343_v41 = vpop.permute.xlu1 %342  ;;  %v250_v42 = vpop.permute.xlu0 %249 }
 0x243   :  { %v350_v44 = vadd.f32 %v348_v31, %v343_v41  ;;  %v257_v45 = vadd.f32 %v255_v32, %v250_v42  ;;  %v262_v46 = vsel %vm258_vm5, %v256_v37, %v260_v40  ;;  %v355_v47 = vsel %vm351_vm4, %v349_v36, %v353_v39 }
 0x244   :  { %v264_v48 = vadd.f32 %v4857_v38, %v262_v46  ;;  %v357_v50 = vadd.f32 %v4857_v38, %v355_v47 }
 0x245   :  { %vm352_vm7 = vcmp.gt.f32.partialorder %v350_v44, 0.0  ;;  %v354_v51 = vmul.f32 0.2, %v350_v44  ;;  %vm259_vm8 = vcmp.gt.f32.partialorder %v257_v45, 0.0  ;;  %v261_v52 = vmul.f32 0.2, %v257_v45 }
 0x246   :  { %v267_v54 = vsel %vm266_vm6, %v264_v48, -inf  ;;  %v359_v63 = vsel %vm266_vm6, %v357_v50, -inf }
 0x247   :  { %v447_v55 = vpop.permute.xlu1 %446  ;;  %v443_v56 = vpop.permute.xlu0 %442  ;;  %268 = vmax.xlane.f32.xlu1 %v267_v54  ;;  %v263_v57 = vsel %vm259_vm8, %v257_v45, %v261_v52  ;;  %v356_v59 = vsel %vm352_vm7, %v350_v44, %v354_v51 }
 0x248   :  { %v454_v60 = vadd.f32 %v452_v53, %v447_v55  ;;  %v453_v61 = vadd.f32 %v452_v53, %v443_v56  ;;  %v265_v62 = vadd.f32 %v4863_v49, %v263_v57  ;;  %v358_v1 = vadd.f32 %v4863_v49, %v356_v59 }
 0x24a   :  { %vm456_vm9 = vcmp.gt.f32.partialorder %v454_v60, 0.0  ;;  %v458_v2 = vmul.f32 0.2, %v454_v60  ;;  %vm455_vm10 = vcmp.gt.f32.partialorder %v453_v61, 0.0  ;;  %v457_v3 = vmul.f32 0.2, %v453_v61 }
 0x24b   :  { %v270_v4 = vsel %vm266_vm6, %v265_v62, -inf  ;;  %360 = vmax.xlane.f32.xlu1 %v359_v63  ;;  %v362_v15 = vsel %vm266_vm6, %v358_v1, -inf }
 0x24c   :  { %271 = vmax.xlane.f32.xlu0 %v270_v4  ;;  %v546_v6 = vpop.permute.xlu1 %545  ;;  %v550_v7 = vpop.permute.xlu0 %549  ;;  %v459_v8 = vsel %vm455_vm10, %v453_v61, %v457_v3  ;;  %v460_v10 = vsel %vm456_vm9, %v454_v60, %v458_v2 }
 0x24d   :  { %v556_v11 = vadd.f32 %v555_v5, %v546_v6  ;;  %v557_v12 = vadd.f32 %v555_v5, %v550_v7  ;;  %v461_v14 = vadd.f32 %v4857_v38, %v459_v8  ;;  %v462_v16 = vadd.f32 %v4863_v49, %v460_v10 }
 0x24f   :  { %vm558_vm11 = vcmp.gt.f32.partialorder %v556_v11, 0.0  ;;  %v560_v17 = vmul.f32 0.2, %v556_v11  ;;  %vm559_vm12 = vcmp.gt.f32.partialorder %v557_v12, 0.0  ;;  %v561_v18 = vmul.f32 0.2, %v557_v12 }
 0x250   :  { %363 = vmax.xlane.f32.xlu0 %v362_v15  ;;  %v463_v19 = vsel %vm266_vm6, %v461_v14, -inf  ;;  %v466_v23 = vsel %vm266_vm6, %v462_v16, -inf }
 0x251   :  { %464 = vmax.xlane.f32.xlu1 %v463_v19  ;;  %v562_v20 = vsel %vm558_vm11, %v556_v11, %v560_v17  ;;  %v563_v21 = vsel %vm559_vm12, %v557_v12, %v561_v18 }
 0x252   :  { %v564_v22 = vadd.f32 %v4857_v38, %v562_v20  ;;  %v565_v24 = vadd.f32 %v4863_v49, %v563_v21 }
 0x254   :  { %467 = vmax.xlane.f32.xlu0 %v466_v23  ;;  %v566_v25 = vsel %vm266_vm6, %v564_v22, -inf  ;;  %v569_v26 = vsel %vm266_vm6, %v565_v24, -inf }
 0x255   :  { %567 = vmax.xlane.f32.xlu1 %v566_v25 }
 0x258   :  { %570 = vmax.xlane.f32.xlu0 %v569_v26 }
 0x266   :  { %383 = vrot.lane.b32.xlu1 %v4821_v13, %s4663_s4 }
 0x2d4   :  { %v269_v27 = vpop.xlane.xlu1 %268 }
 0x2d5   :  { %v273_v31 = vsub.f32 %v264_v48, %v269_v27 }
 0x2d7   :  { %v275_v32 = vmul.f32 1.442695, %v273_v31 }
 0x2d8   :  { %v361_v33 = vpop.xlane.xlu1 %360 }
 0x2d9   :  { %4549 = vpow2.f32 %v275_v32  ;;  %v272_v34 = vpop.xlane.xlu0 %271  ;;  %v365_v35 = vsub.f32 %v357_v50, %v361_v33 }
 0x2da   :  { %v274_v36 = vsub.f32 %v265_v62, %v272_v34 }
 0x2db   :  { %v367_v37 = vmul.f32 1.442695, %v365_v35 }
 0x2dc   :  { %v277_v39 = vmul.f32 1.442695, %v274_v36 }
 0x2dd   :  { %4551 = vpow2.f32 %v367_v37  ;;  %v364_v40 = vpop.xlane.xlu0 %363 }
 0x2de   :  { %4553 = vpow2.f32 %v277_v39  ;;  %v366_v41 = vsub.f32 %v358_v1, %v364_v40  ;;  %v465_v42 = vpop.xlane.xlu1 %464 }
 0x2df   :  { %v469_v44 = vsub.f32 %v461_v14, %v465_v42 }
 0x2e0   :  { %v369_v45 = vmul.f32 1.442695, %v366_v41 }
 0x2e1   :  { %v471_v46 = vmul.f32 1.442695, %v469_v44  ;;  %v468_v47 = vpop.xlane.xlu0 %467 }
 0x2e2   :  { %4555 = vpow2.f32 %v369_v45  ;;  %v470_v51 = vsub.f32 %v462_v16, %v468_v47  ;;  %v568_v48 = vpop.xlane.xlu1 %567 }
 0x2e3   :  { %v4550_v52 = vpop.eup %4549  ;;  %4557 = vpow2.f32 %v471_v46  ;;  %v572_v53 = vsub.f32 %v564_v22, %v568_v48 }
 0x2e4   :  { %v473_v54 = vmul.f32 1.442695, %v470_v51  ;;  %v279_v50 = vsel %vm266_vm6, %v4550_v52, 0.0 }
 0x2e5   :  { %v574_v55 = vmul.f32 1.442695, %v572_v53  ;;  %v571_v56 = vpop.xlane.xlu0 %570  ;;  %280 = vadd.xlane.f32.xlu1 %v279_v50  ;;  %v4407_v53 = vld [vmem:[%s5769_s24] sm:$0xff]  }
 0x2e6   :  { %4559 = vpow2.f32 %v473_v54  ;;  %v573_v57 = vsub.f32 %v565_v24, %v571_v56  ;;  %v384_v59 = vpop.permute.xlu1 %383 }
 0x2e7   :  { %v4552_v60 = vpop.eup %4551  ;;  %4561 = vpow2.f32 %v574_v55  ;;  %4253 = vmatpush3.bf16.msra.mxu0 %v384_v59  ;;  %v4408_v55 = vld [vmem:[%s5769_s24 + $0x8] sm:$0xff]   ;;  %s4670_s24 = smov 96  }
 0x2e8   :  { %v4554_v61 = vpop.eup %4553  ;;  %v576_v62 = vmul.f32 1.442695, %v573_v57  ;;  %v371_v63 = vsel %vm266_vm6, %v4552_v60, 0.0  ;;  %4264 = vmatprep.subr.bf16.mxu0 %v4657_v0 }
 0x2e9   :  { %v282_v1 = vsel %vm266_vm6, %v4554_v61, 0.0  ;;  %372 = vadd.xlane.f32.xlu1 %v371_v63 }
 0x2ea   :  { %4563 = vpow2.f32 %v576_v62  ;;  %283 = vadd.xlane.f32.xlu0 %v282_v1 }
 0x2ec   :  { %v4556_v2 = vpop.eup %4555 }
 0x2ed   :  { %v4558_v3 = vpop.eup %4557  ;;  %v374_v4 = vsel %vm266_vm6, %v4556_v2, 0.0 }
 0x2ee   :  { %375 = vadd.xlane.f32.xlu0 %v374_v4  ;;  %v475_v5 = vsel %vm266_vm6, %v4558_v3, 0.0 }
 0x2ef   :  { %476 = vadd.xlane.f32.xlu1 %v475_v5 }
 0x2f0   :  { %v4560_v6 = vpop.eup %4559 }
 0x2f1   :  { %v4562_v7 = vpop.eup %4561  ;;  %v478_v8 = vsel %vm266_vm6, %v4560_v6, 0.0 }
 0x2f2   :  { %479 = vadd.xlane.f32.xlu0 %v478_v8  ;;  %v578_v10 = vsel %vm266_vm6, %v4562_v7, 0.0 }
 0x2f3   :  { %579 = vadd.xlane.f32.xlu1 %v578_v10 }
 0x2f4   :  { %v4564_v11 = vpop.eup %4563 }
 0x2f5   :  { %v581_v12 = vsel %vm266_vm6, %v4564_v11, 0.0 }
 0x2f6   :  { %582 = vadd.xlane.f32.xlu0 %v581_v12  ;;  %v3788_v12 = vld [vmem:[%s5770_s29] ss:$0 sm:$0xff] }
 0x304   :  { %589 = vrot.lane.b32.xlu1 %v4821_v13, %s4664_s0 }
 0x30c   :  { %486 = vrot.lane.b32.xlu0 %v4821_v13, %s4665_s23 }
 0x372   :  { %v281_v14 = vpop.xlane.xlu1 %280 }
 0x373   :  { %4565 = vrcp.f32 %v281_v14 }
 0x376   :  { %v373_v15 = vpop.xlane.xlu1 %372 }
 0x377   :  { %v284_v16 = vpop.xlane.xlu0 %283 }
 0x378   :  { %4567 = vrcp.f32 %v284_v16 }
 0x379   :  { %4569 = vrcp.f32 %v373_v15 }
 0x37b   :  { %v376_v17 = vpop.xlane.xlu0 %375 }
 0x37c   :  { %4571 = vrcp.f32 %v376_v17  ;;  %v477_v18 = vpop.xlane.xlu1 %476 }
 0x37d   :  { %4573 = vrcp.f32 %v477_v18  ;;  %v4566_v20 = vpop.eup %4565 }
 0x37e   :  { %v287_v23 = vmul.f32 %v4566_v20, %v4550_v52 }
 0x37f   :  { %v480_v19 = vpop.xlane.xlu0 %479 }
 0x380   :  { %4575 = vrcp.f32 %v480_v19  ;;  %v580_v21 = vpop.xlane.xlu1 %579 }
 0x381   :  { %4577 = vrcp.f32 %v580_v21 }
 0x382   :  { %v4568_v22 = vpop.eup %4567 }
 0x383   :  { %v288_v24 = vmul.f32 %v4568_v22, %v4554_v61  ;;  %v583_v25 = vpop.xlane.xlu0 %582  ;;  %v4570_v13 = vpop.eup %4569 }
 0x384   :  { %4579 = vrcp.f32 %v583_v25  ;;  %v379_v31 = vmul.f32 %v4570_v13, %v4552_v60  ;;  %v590_v40 = vpop.permute.xlu1 %589 }
 0x385   :  { %v289_v26 = vpack.c.bf16 %v288_v24, %v287_v23 }
 0x386   :  { %v4572_v27 = vpop.eup %4571 }
 0x387   :  { %v380_v32 = vmul.f32 %v4572_v27, %v4556_v2  ;;  %v487_v33 = vpop.permute.xlu0 %486  ;;  %4249 = vmatmul.mubr.msk.bf16.vlgmr.msra.gmra.mrb[8].mxu1 %vm266_vm6, %v289_v26  ;;  %v4574_v34 = vpop.eup %4573 }
 0x388   :  { %4259 = vmatpush3.bf16.msra.mxu1 %v487_v33  ;;  %4260 = vmatprep.mubr.msk.bf16.mxu1 %vm4658_vm1, %v4657_v0  ;;  %v483_v37 = vmul.f32 %v4574_v34, %v4558_v3 }
 0x389   :  { %v381_v35 = vpack.c.bf16 %v380_v32, %v379_v31  ;;  %4270 = vmatprep.subr.bf16.mxu1 %v4657_v0  ;;  %v3791_v31 = vld [vmem:[%s5738_s7] ss:$0 sm:$0xff]  ;;  %s4672_s7 = smov 72  }
 0x38a   :  { %v4576_v36 = vpop.eup %4575 }
 0x38b   :  { %v484_v39 = vmul.f32 %v4576_v36, %v4560_v6  ;;  %4255 = vmatmul.mubr.msk.bf16.vlgmr.msra.gmra.mrb[4].mxu0 %vm266_vm6, %v381_v35  ;;  %v4578_v41 = vpop.eup %4577 }
 0x38c   :  { %4265 = vmatpush3.bf16.msra.mxu0 %v590_v40  ;;  %4266 = vmatprep.mubr.msk.bf16.mxu0 %vm4658_vm1, %v4657_v0  ;;  %v586_v45 = vmul.f32 %v4578_v41, %v4562_v7 }
 0x38d   :  { %v485_v42 = vpack.c.bf16 %v484_v39, %v483_v37  ;;  %4278 = vmatprep.subr.bf16.mxu0 %v4657_v0 }
 0x38e   :  { %v4580_v44 = vpop.eup %4579 }
 0x38f   :  { %v587_v46 = vmul.f32 %v4580_v44, %v4564_v11  ;;  %4261 = vmatmul.mubr.msk.bf16.vlgmr.msra.gmra.mrb[12].mxu1 %vm266_vm6, %v485_v42 }
 0x390   :  { %4274 = vmatprep.mubr.msk.bf16.mxu1 %vm4658_vm1, %v4657_v0  ;;  %4271 = vmatpush3.bf16.msra.mxu1 %v4407_v53 }
 0x391   :  { %v588_v47 = vpack.c.bf16 %v587_v46, %v586_v45  ;;  %4272 = vmatprep.subr.bf16.mxu1 %v4657_v0 }
 0x393   :  { %4267 = vmatmul.mubr.msk.bf16.vlgmr.msra.gmra.mrb[8].mxu0 %vm266_vm6, %v588_v47 }
 0x394   :  { %4280 = vmatprep.mubr.msk.bf16.mxu0 %vm4658_vm1, %v4657_v0  ;;  %4273 = vmatpush3.bf16.msra.mxu1 %v4408_v55 }
 0x395   :  { %4284 = vmatprep.subr.bf16.mxu1 %v4657_v0 }
 0x45a   :  { %v327_v51 = vpop.f32.mrb[8].mxu1 }
 0x45b   :  { %335 = vst.msk [vmem:[#allocation2] sm:$0xff] %vm334_vm13, %v327_v51  ;;  %v4250_v48 = vpop.f32.mrb[9].mxu1 }
 0x45c   :  { %v330_v52 = vpop.f32.mrb[10].mxu1 }
 0x45d   :  { %336 = vst.msk [vmem:[#allocation2 + $0x8] sm:$0xff] %vm334_vm13, %v330_v52  ;;  %v4251_v54 = vpop.f32.mrb[11].mxu1 }
 0x45e   :  { %v423_v50 = vpop.f32.mrb[4].mxu0 }
 0x45f   :  { %432 = vrot.lane.b32.xlu1 %v423_v50, %s4666_s26  ;;  %v4256_v56 = vpop.f32.mrb[5].mxu0 }
 0x460   :  { %v426_v57 = vpop.f32.mrb[6].mxu0 }
 0x461   :  { %434 = vrot.lane.b32.xlu0 %v426_v57, %s4666_s26  ;;  %v4257_v59 = vpop.f32.mrb[7].mxu0 }
 0x462   :  { %v526_v60 = vpop.f32.mrb[12].mxu1 }
 0x463   :  { %535 = vrot.lane.b32.xlu1 %v526_v60, %s4667_s2  ;;  %v4262_v61 = vpop.f32.mrb[13].mxu1 }
 0x464   :  { %v529_v62 = vpop.f32.mrb[14].mxu1 }
 0x465   :  { %537 = vrot.lane.b32.xlu0 %v529_v62, %s4667_s2  ;;  %v4263_v63 = vpop.f32.mrb[15].mxu1 }
 0x466   :  { %v629_v1 = vpop.f32.mrb[8].mxu0 }
 0x467   :  { %638 = vrot.lane.b32.xlu1 %v629_v1, %s4668_s27  ;;  %v4268_v2 = vpop.f32.mrb[9].mxu0 }
 0x468   :  { %v632_v3 = vpop.f32.mrb[10].mxu0 }
 0x469   :  { %640 = vrot.lane.b32.xlu0 %v632_v3, %s4668_s27  ;;  %v4269_v4 = vpop.f32.mrb[11].mxu0 }
 0x4d1   :  { %v433_v5 = vpop.permute.xlu1 %432 }
 0x4d2   :  { %439 = vst.msk [vmem:[#allocation2] sm:$0xff] %vm438_vm14, %v433_v5 }
 0x4d3   :  { %v435_v6 = vpop.permute.xlu0 %434 }
 0x4d4   :  { %440 = vst.msk [vmem:[#allocation2 + $0x8] sm:$0xff] %vm438_vm14, %v435_v6 }
 0x4d5   :  { %v536_v7 = vpop.permute.xlu1 %535 }
 0x4d6   :  { %542 = vst.msk [vmem:[#allocation2] sm:$0xff] %vm541_vm15, %v536_v7 }
 0x4d7   :  { %v538_v8 = vpop.permute.xlu0 %537 }
 0x4d8   :  { %543 = vst.msk [vmem:[#allocation2 + $0x8] sm:$0xff] %vm541_vm15, %v538_v8 }
 0x4d9   :  { %v639_v10 = vpop.permute.xlu1 %638 }
 0x4da   :  { %645 = vst.msk [vmem:[#allocation2] sm:$0xff] %vm644_vm0, %v639_v10 }
 0x4db   :  { %v641_v11 = vpop.permute.xlu0 %640 }
 0x4dc   :  { %646 = vst.msk [vmem:[#allocation2 + $0x8] sm:$0xff] %vm644_vm0, %v641_v11 }
 0x4e1   :  { %v647_v14 = vld [vmem:[#allocation2] sm:$0xff] }
 0x4e2   :  { %v656_v15 = vadd.f32 %v3788_v12, %v647_v14 }
 0x4e3   :  { %v648_v16 = vld [vmem:[#allocation2 + $0x8] sm:$0xff] }
 0x4e4   :  { %v657_v17 = vadd.f32 %v3788_v12, %v648_v16  ;;  %v660_v18 = vmin.f32 %v656_v15, 0.0  ;;  %vm658_vm2 = vcmp.gt.f32.partialorder %v656_v15, 0.0 }
 0x4e6   :  { %v661_v19 = vmin.f32 %v657_v17, 0.0  ;;  %v662_v20 = vmul.f32 1.442695, %v660_v18  ;;  %vm659_vm4 = vcmp.gt.f32.partialorder %v657_v17, 0.0 }
 0x4e8   :  { %4581 = vpow2.f32 %v662_v20  ;;  %v664_v21 = vmul.f32 1.442695, %v661_v19 }
 0x4ea   :  { %4583 = vpow2.f32 %v664_v21 }
 0x4f2   :  { %v4582_v22 = vpop.eup %4581 }
 0x4f3   :  { %v3789_v23 = vadd.f32 -1.0, %v4582_v22 }
 0x4f4   :  { %v4584_v24 = vpop.eup %4583 }
 0x4f5   :  { %v3790_v25 = vadd.f32 -1.0, %v4584_v24  ;;  %v4941_v13 = vsel %vm658_vm2, %v656_v15, %v3789_v23 }
 0x4f7   :  { %v4943_v26 = vsel %vm659_vm4, %v657_v17, %v3790_v25 }
 0x4f8   :  { %v674_v27 = vpack.c.bf16 %v4943_v26, %v4941_v13 }
 0x4fa   :  { %4275 = vmatmul.mubr.msk.bf16.vlgmr.msra.gmra.mrb[16].mxu1 %vm153_vm3, %v674_v27 }
 0x4fb   :  { %4286 = vmatprep.mubr.msk.bf16.mxu1 %vm4658_vm1, %v4657_v0 }
 0x5cd   :  { %v731_v32 = vpop.f32.mrb[16].mxu1 }
 0x5ce   :  { %v732_v33 = vadd.f32 %v3791_v31, %v731_v32  ;;  %v4276_v34 = vpop.f32.mrb[17].mxu1 }
 0x5cf   :  { %v734_v35 = vpop.f32.mrb[18].mxu1 }
 0x5d0   :  { %v735_v36 = vadd.f32 %v3791_v31, %v734_v35  ;;  %v4277_v37 = vpop.f32.mrb[19].mxu1  ;;  %v738_v39 = vmul.f32 0.35355338, %v732_v33 }
 0x5d2   :  { %v739_v40 = vmul.f32 0.35355338, %v735_v36  ;;  %v4953_v41 = vpack.c.bf16 %v735_v36, %v732_v33 }
 0x5d4   :  { %v740_v42 = vpack.c.bf16 %v739_v40, %v738_v39  ;;  %867 = vrot.lane.b32.xlu0 %v4953_v41, %s4669_s5  ;;  %743 = vrot.lane.b32.xlu1 %v4953_v41, %s4670_s24 }
 0x5d8   :  { %998 = vrot.lane.b32.xlu0 %v4953_v41, %s4671_s6  ;;  %865 = vrot.lane.b32.xlu1 %v740_v42, %s4663_s4  ;;  %s4673_s4 = smov 64  }
 0x5dc   :  { %1129 = vrot.lane.b32.xlu0 %v4953_v41, %s4672_s7  ;;  %996 = vrot.lane.b32.xlu1 %v740_v42, %s4665_s23  ;;  %s4675_s23 = smov 40  }
 0x5e0   :  { %1127 = vrot.lane.b32.xlu1 %v740_v42, %s4664_s0  ;;  %s4674_s0 = smov 48  }
 0x646   :  { %v744_v44 = vpop.permute.xlu1 %743  ;;  %v868_v46 = vpop.permute.xlu0 %867 }
 0x647   :  { %v749_v45 = vsel %vm334_vm13, %v744_v44, 0  ;;  %v873_v47 = vsel %vm334_vm13, %v868_v46, 0 }
 0x648   :  { %4279 = vmatpush3.bf16.xpose.msra.mxu0 %v749_v45 }
 0x649   :  { %4290 = vmatprep.subr.bf16.mxu0 %v4657_v0 }
 0x64a   :  { %v999_v51 = vpop.permute.xlu0 %998  ;;  %v866_v48 = vpop.permute.xlu1 %865 }
 0x64b   :  { %v1004_v52 = vsel %vm334_vm13, %v999_v51, 0 }
 0x64e   :  { %v1130_v53 = vpop.permute.xlu0 %1129  ;;  %v997_v54 = vpop.permute.xlu1 %996 }
 0x64f   :  { %4281 = vmatmul.mubr.msk.bf16.vlgmr.msra.gmra.mrb[12].mxu0 %vm334_vm13, %v740_v42  ;;  %v1135_v50 = vsel %vm334_vm13, %v1130_v53, 0 }
 0x650   :  { %4291 = vmatpush3.bf16.xpose.msra.mxu0 %v873_v47  ;;  %4292 = vmatprep.mubr.msk.bf16.mxu0 %vm4658_vm1, %v4657_v0 }
 0x651   :  { %4302 = vmatprep.subr.bf16.mxu0 %v4657_v0 }
 0x652   :  { %v1128_v55 = vpop.permute.xlu1 %1127 }
 0x657   :  { %4293 = vmatmul.mubr.msk.bf16.vlgmr.msra.gmra.mrb[16].mxu0 %vm334_vm13, %v866_v48 }
 0x658   :  { %4303 = vmatpush3.bf16.xpose.msra.mxu0 %v1004_v52  ;;  %4304 = vmatprep.mubr.msk.bf16.mxu0 %vm4658_vm1, %v4657_v0 }
 0x659   :  { %4314 = vmatprep.subr.bf16.mxu0 %v4657_v0 }
 0x65f   :  { %4305 = vmatmul.mubr.msk.bf16.vlgmr.msra.gmra.mrb[20].mxu0 %vm334_vm13, %v997_v54 }
 0x660   :  { %4315 = vmatpush3.bf16.xpose.msra.mxu0 %v1135_v50  ;;  %4316 = vmatprep.mubr.msk.bf16.mxu0 %vm4658_vm1, %v4657_v0 }
 0x661   :  { %4326 = vmatprep.subr.bf16.mxu0 %v4657_v0 }
 0x667   :  { %4317 = vmatmul.mubr.msk.bf16.vlgmr.msra.gmra.mrb[24].mxu0 %vm334_vm13, %v1128_v55 }
 0x668   :  { %4330 = vmatprep.mubr.msk.bf16.mxu0 %vm4658_vm1, %v4657_v0 }
 0x722   :  { %v785_v56 = vpop.f32.mrb[12].mxu0 }
 0x723   :  { %v4282_v57 = vpop.f32.mrb[13].mxu0  ;;  %v792_v59 = vsel %vm266_vm6, %v785_v56, -inf }
 0x724   :  { %793 = vmax.xlane.f32.xlu0 %v792_v59  ;;  %v788_v60 = vpop.f32.mrb[14].mxu0 }
 0x725   :  { %v4283_v61 = vpop.f32.mrb[15].mxu0  ;;  %v795_v62 = vsel %vm266_vm6, %v788_v60, -inf }
 0x726   :  { %796 = vmax.xlane.f32.xlu1 %v795_v62 }
 0x72a   :  { %v909_v63 = vpop.f32.mrb[16].mxu0 }
 0x72b   :  { %v4294_v1 = vpop.f32.mrb[17].mxu0  ;;  %v916_v2 = vsel %vm266_vm6, %v909_v63, -inf }
 0x72c   :  { %917 = vmax.xlane.f32.xlu0 %v916_v2  ;;  %v912_v3 = vpop.f32.mrb[18].mxu0 }
 0x72d   :  { %v4295_v4 = vpop.f32.mrb[19].mxu0  ;;  %v919_v5 = vsel %vm266_vm6, %v912_v3, -inf }
 0x730   :  { %920 = vmax.xlane.f32.xlu0 %v919_v5 }
 0x732   :  { %v1040_v6 = vpop.f32.mrb[20].mxu0 }
 0x733   :  { %v4306_v7 = vpop.f32.mrb[21].mxu0  ;;  %v1047_v8 = vsel %vm266_vm6, %v1040_v6, -inf }
 0x734   :  { %1048 = vmax.xlane.f32.xlu1 %v1047_v8  ;;  %v1043_v10 = vpop.f32.mrb[22].mxu0 }
 0x735   :  { %v4307_v11 = vpop.f32.mrb[23].mxu0  ;;  %v1050_v12 = vsel %vm266_vm6, %v1043_v10, -inf }
 0x736   :  { %1051 = vmax.xlane.f32.xlu0 %v1050_v12 }
 0x73a   :  { %v1171_v14 = vpop.f32.mrb[24].mxu0 }
 0x73b   :  { %v4318_v15 = vpop.f32.mrb[25].mxu0  ;;  %v1178_v16 = vsel %vm266_vm6, %v1171_v14, -inf }
 0x73c   :  { %1179 = vmax.xlane.f32.xlu1 %v1178_v16  ;;  %v1174_v17 = vpop.f32.mrb[26].mxu0 }
 0x73d   :  { %v4319_v18 = vpop.f32.mrb[27].mxu0  ;;  %v1181_v19 = vsel %vm266_vm6, %v1174_v17, -inf }
 0x73e   :  { %1182 = vmax.xlane.f32.xlu0 %v1181_v19 }
 0x74d   :  { %815 = vrot.lane.b32.xlu1 %v4953_v41, %s4673_s4 }
 0x7b1   :  { %v794_v20 = vpop.xlane.xlu0 %793 }
 0x7b2   :  { %v798_v21 = vsub.f32 %v785_v56, %v794_v20 }
 0x7b3   :  { %v797_v22 = vpop.xlane.xlu1 %796 }
 0x7b4   :  { %v800_v23 = vmul.f32 1.442695, %v798_v21  ;;  %v799_v24 = vsub.f32 %v788_v60, %v797_v22 }
 0x7b6   :  { %4585 = vpow2.f32 %v800_v23  ;;  %v802_v25 = vmul.f32 1.442695, %v799_v24 }
 0x7b8   :  { %4587 = vpow2.f32 %v802_v25 }
 0x7b9   :  { %v918_v27 = vpop.xlane.xlu0 %917 }
 0x7ba   :  { %v922_v31 = vsub.f32 %v909_v63, %v918_v27 }
 0x7bc   :  { %v924_v32 = vmul.f32 1.442695, %v922_v31 }
 0x7bd   :  { %v921_v33 = vpop.xlane.xlu0 %920 }
 0x7be   :  { %4589 = vpow2.f32 %v924_v32  ;;  %v923_v34 = vsub.f32 %v912_v3, %v921_v33 }
 0x7c0   :  { %v4586_v35 = vpop.eup %4585  ;;  %v926_v36 = vmul.f32 1.442695, %v923_v34 }
 0x7c1   :  { %v1049_v37 = vpop.xlane.xlu1 %1048  ;;  %v804_v39 = vsel %vm266_vm6, %v4586_v35, 0.0 }
 0x7c2   :  { %v4588_v40 = vpop.eup %4587  ;;  %4591 = vpow2.f32 %v926_v36  ;;  %v1053_v42 = vsub.f32 %v1040_v6, %v1049_v37  ;;  %805 = vadd.xlane.f32.xlu1 %v804_v39 }
 0x7c3   :  { %v1052_v44 = vpop.xlane.xlu0 %1051  ;;  %v807_v45 = vsel %vm266_vm6, %v4588_v40, 0.0 }
 0x7c4   :  { %v1055_v46 = vmul.f32 1.442695, %v1053_v42  ;;  %v1054_v47 = vsub.f32 %v1043_v10, %v1052_v44  ;;  %808 = vadd.xlane.f32.xlu0 %v807_v45 }
 0x7c6   :  { %4593 = vpow2.f32 %v1055_v46  ;;  %v1057_v51 = vmul.f32 1.442695, %v1054_v47 }
 0x7c8   :  { %v4590_v48 = vpop.eup %4589  ;;  %4595 = vpow2.f32 %v1057_v51 }
 0x7c9   :  { %v1180_v52 = vpop.xlane.xlu1 %1179  ;;  %v928_v53 = vsel %vm266_vm6, %v4590_v48, 0.0 }
 0x7ca   :  { %v1184_v54 = vsub.f32 %v1171_v14, %v1180_v52  ;;  %929 = vadd.xlane.f32.xlu1 %v928_v53 }
 0x7cb   :  { %v1183_v50 = vpop.xlane.xlu0 %1182 }
 0x7cc   :  { %v4592_v55 = vpop.eup %4591  ;;  %v1186_v56 = vmul.f32 1.442695, %v1184_v54  ;;  %v1185_v57 = vsub.f32 %v1174_v17, %v1183_v50 }
 0x7cd   :  { %v816_v59 = vpop.permute.xlu1 %815  ;;  %v931_v60 = vsel %vm266_vm6, %v4592_v55, 0.0 }
 0x7ce   :  { %4597 = vpow2.f32 %v1186_v56  ;;  %v1188_v61 = vmul.f32 1.442695, %v1185_v57  ;;  %4285 = vmatpush3.bf16.msra.mxu1 %v816_v59  ;;  %932 = vadd.xlane.f32.xlu0 %v931_v60  ;;  %v4410_v57 = vld [vmem:[%s5739_s8 + $0x8] sm:$0xff]  }
 0x7cf   :  { %4296 = vmatprep.subr.bf16.mxu1 %v4657_v0 }
 0x7d0   :  { %v4594_v62 = vpop.eup %4593  ;;  %4599 = vpow2.f32 %v1188_v61 }
 0x7d1   :  { %v1059_v63 = vsel %vm266_vm6, %v4594_v62, 0.0 }
 0x7d2   :  { %v4596_v1 = vpop.eup %4595  ;;  %1060 = vadd.xlane.f32.xlu1 %v1059_v63 }
 0x7d3   :  { %v1062_v2 = vsel %vm266_vm6, %v4596_v1, 0.0 }
 0x7d4   :  { %1063 = vadd.xlane.f32.xlu0 %v1062_v2 }
 0x7d8   :  { %v4598_v3 = vpop.eup %4597 }
 0x7d9   :  { %v1190_v4 = vsel %vm266_vm6, %v4598_v3, 0.0 }
 0x7da   :  { %v4600_v5 = vpop.eup %4599  ;;  %1191 = vadd.xlane.f32.xlu1 %v1190_v4 }
 0x7db   :  { %v1193_v6 = vsel %vm266_vm6, %v4600_v5, 0.0 }
 0x7dc   :  { %1194 = vadd.xlane.f32.xlu0 %v1193_v6 }
 0x7eb   :  { %1070 = vrot.lane.b32.xlu1 %v4953_v41, %s4674_s0 }
 0x7ef   :  { %1201 = vrot.lane.b32.xlu1 %v4953_v41, %s4675_s23 }
 0x7f2   :  { %939 = vrot.lane.b32.xlu0 %v4953_v41, %s4676_s25 }
 0x84f   :  { %v806_v7 = vpop.xlane.xlu1 %805 }
 0x850   :  { %4601 = vrcp.f32 %v806_v7 }
 0x851   :  { %v809_v8 = vpop.xlane.xlu0 %808 }
 0x852   :  { %4603 = vrcp.f32 %v809_v8 }
 0x857   :  { %v930_v16 = vpop.xlane.xlu1 %929 }
 0x85a   :  { %v4602_v10 = vpop.eup %4601 }
 0x85b   :  { %v933_v11 = vpop.xlane.xlu0 %932  ;;  %v812_v14 = vmul.f32 %v4602_v10, %v4586_v35 }
 0x85c   :  { %v4604_v12 = vpop.eup %4603  ;;  %4605 = vrcp.f32 %v933_v11 }
 0x85d   :  { %v813_v15 = vmul.f32 %v4604_v12, %v4588_v40  ;;  %4607 = vrcp.f32 %v930_v16 }
 0x85f   :  { %v814_v17 = vpack.c.bf16 %v813_v15, %v812_v14  ;;  %v1061_v41 = vpop.xlane.xlu1 %1060  ;;  %v3803_v14 = vld [vmem:[%s5740_s9] ss:$0 sm:$0xff] }
 0x861   :  { %4287 = vmatmul.mubr.msk.bf16.vlgmr.msra.gmra.mrb[20].mxu1 %vm266_vm6, %v814_v17  ;;  %v1064_v18 = vpop.xlane.xlu0 %1063 }
 0x862   :  { %4298 = vmatprep.mubr.msk.bf16.mxu1 %vm4658_vm1, %v4657_v0  ;;  %4609 = vrcp.f32 %v1064_v18 }
 0x863   :  { %4611 = vrcp.f32 %v1061_v41 }
 0x866   :  { %v4606_v19 = vpop.eup %4605 }
 0x867   :  { %v4608_v21 = vpop.eup %4607  ;;  %v937_v22 = vmul.f32 %v4606_v19, %v4592_v55  ;;  %v1192_v23 = vpop.xlane.xlu1 %1191  ;;  %v4409_v55 = vld [vmem:[%s5739_s8] sm:$0xff]  }
 0x868   :  { %v936_v24 = vmul.f32 %v4608_v21, %v4590_v48  ;;  %4327 = vmatpush3.bf16.msra.mxu0 %v4409_v55 }
 0x869   :  { %v1195_v20 = vpop.xlane.xlu0 %1194  ;;  %4328 = vmatprep.subr.bf16.mxu0 %v4657_v0 }
 0x86a   :  { %4613 = vrcp.f32 %v1195_v20  ;;  %v938_v27 = vpack.c.bf16 %v937_v22, %v936_v24 }
 0x86b   :  { %4615 = vrcp.f32 %v1192_v23  ;;  %v1071_v32 = vpop.permute.xlu1 %1070 }
 0x86c   :  { %v4610_v31 = vpop.eup %4609  ;;  %4329 = vmatpush3.bf16.msra.mxu0 %v4410_v57  ;;  %v1385_v57 = vld [vmem:[%s5741_s10 + $0x50] sm:$0xff] }
 0x86d   :  { %v940_v25 = vpop.permute.xlu0 %939  ;;  %v4612_v33 = vpop.eup %4611  ;;  %v1068_v34 = vmul.f32 %v4610_v31, %v4596_v1 }
 0x86e   :  { %4297 = vmatpush3.bf16.msra.mxu1 %v940_v25  ;;  %v1067_v35 = vmul.f32 %v4612_v33, %v4594_v62 }
 0x86f   :  { %4308 = vmatprep.subr.bf16.mxu1 %v4657_v0  ;;  %v1202_v39 = vpop.permute.xlu1 %1201 }
 0x870   :  { %v1069_v36 = vpack.c.bf16 %v1068_v34, %v1067_v35 }
 0x871   :  { %4299 = vmatmul.mubr.msk.bf16.vlgmr.msra.gmra.mrb[24].mxu1 %vm266_vm6, %v938_v27 }
 0x872   :  { %4309 = vmatpush3.bf16.msra.mxu1 %v1071_v32  ;;  %4310 = vmatprep.mubr.msk.bf16.mxu1 %vm4658_vm1, %v4657_v0 }
 0x873   :  { %4320 = vmatprep.subr.bf16.mxu1 %v4657_v0 }
 0x874   :  { %v4614_v37 = vpop.eup %4613 }
 0x875   :  { %v4616_v40 = vpop.eup %4615  ;;  %v1199_v42 = vmul.f32 %v4614_v37, %v4600_v5  ;;  %v1383_v37 = vld [vmem:[%s5741_s10 + $0x40] sm:$0xff] }
 0x876   :  { %v1198_v44 = vmul.f32 %v4616_v40, %v4598_v3 }
 0x878   :  { %v1200_v45 = vpack.c.bf16 %v1199_v42, %v1198_v44  ;;  %v1384_v42 = vld [vmem:[%s5741_s10 + $0x48] sm:$0xff] }
 0x879   :  { %4311 = vmatmul.mubr.msk.bf16.vlgmr.msra.gmra.mrb[28].mxu1 %vm266_vm6, %v1069_v36 }
 0x87a   :  { %4321 = vmatpush3.bf16.msra.mxu1 %v1202_v39  ;;  %4322 = vmatprep.mubr.msk.bf16.mxu1 %vm4658_vm1, %v4657_v0  ;;  %v1376_v39 = vld [vmem:[%s5741_s10 + $0x8] sm:$0xff] }
 0x881   :  { %4323 = vmatmul.mubr.msk.bf16.vlgmr.msra.gmra.mrb[32].mxu1 %vm266_vm6, %v1200_v45  ;;  %v3811_v45 = vcombine.low %v1376_v39, %v1384_v42 }
 0x882   :  { %1687 = vmatprep.mubr.bf16.mxu1 %v4660_v9 }
 0x934   :  { %v855_v46 = vpop.f32.mrb[20].mxu1 }
 0x935   :  { %862 = vst.msk [vmem:[#allocation3] sm:$0xff] %vm334_vm13, %v855_v46  ;;  %v4288_v47 = vpop.f32.mrb[21].mxu1  ;;  %v3812_v46 = vcombine.high %v1376_v39, %v1384_v42  ;;  %v1396_v39 = vld [vmem:[%s5741_s10 + $0xa8] sm:$0xff] }
 0x936   :  { %v858_v51 = vpop.f32.mrb[22].mxu1  ;;  %v1391_v47 = vld [vmem:[%s5741_s10 + $0x80] sm:$0xff] }
 0x937   :  { %863 = vst.msk [vmem:[#allocation3 + $0x8] sm:$0xff] %vm334_vm13, %v858_v51  ;;  %v4289_v48 = vpop.f32.mrb[23].mxu1  ;;  %1698 = vmatprep.subr.bf16.mxu0 %v3812_v46  ;;  %v1399_v51 = vld [vmem:[%s5741_s10 + $0xc0] sm:$0xff] }
 0x938   :  { %v1392_v48 = vld [vmem:[%s5741_s10 + $0x88] sm:$0xff] }
 0x944   :  { %v979_v52 = vpop.f32.mrb[24].mxu1 }
 0x945   :  { %988 = vrot.lane.b32.xlu0 %v979_v52, %s4666_s26  ;;  %v4300_v53 = vpop.f32.mrb[25].mxu1  ;;  %v3826_v52 = vcombine.high %v1391_v47, %v1399_v51 }
 0x946   :  { %v982_v54 = vpop.f32.mrb[26].mxu1  ;;  %v1400_v53 = vld [vmem:[%s5741_s10 + $0xc8] sm:$0xff] }
 0x947   :  { %990 = vrot.lane.b32.xlu1 %v982_v54, %s4666_s26  ;;  %v4301_v50 = vpop.f32.mrb[27].mxu1  ;;  %v3825_v54 = vcombine.low %v1391_v47, %v1399_v51  ;;  %v3828_v55 = vcombine.high %v1392_v48, %v1400_v53  ;;  %v1381_v47 = vld [vmem:[%s5741_s10 + $0x30] sm:$0xff] }
 0x948   :  { %v3827_v50 = vcombine.low %v1392_v48, %v1400_v53  ;;  %v1389_v51 = vld [vmem:[%s5741_s10 + $0x70] sm:$0xff]  ;;  %v1382_v48 = vld [vmem:[%s5741_s10 + $0x38] sm:$0xff] }
 0x94c   :  { %v1110_v56 = vpop.f32.mrb[28].mxu1 }
 0x94d   :  { %1119 = vrot.lane.b32.xlu0 %v1110_v56, %s4667_s2  ;;  %v4312_v59 = vpop.f32.mrb[29].mxu1  ;;  %v1377_v56 = vld [vmem:[%s5741_s10 + $0x10] sm:$0xff] }
 0x94e   :  { %v1113_v60 = vpop.f32.mrb[30].mxu1  ;;  %v1378_v59 = vld [vmem:[%s5741_s10 + $0x18] sm:$0xff] }
 0x94f   :  { %1121 = vrot.lane.b32.xlu1 %v1113_v60, %s4667_s2  ;;  %v4313_v61 = vpop.f32.mrb[31].mxu1  ;;  %v3814_v60 = vcombine.high %v1377_v56, %v1385_v57 }
 0x950   :  { %v1386_v61 = vld [vmem:[%s5741_s10 + $0x58] sm:$0xff] }
 0x954   :  { %v1241_v62 = vpop.f32.mrb[32].mxu1 }
 0x955   :  { %1250 = vrot.lane.b32.xlu0 %v1241_v62, %s4668_s27  ;;  %v4324_v63 = vpop.f32.mrb[33].mxu1  ;;  %v3813_v62 = vcombine.low %v1377_v56, %v1385_v57  ;;  %v1397_v56 = vld [vmem:[%s5741_s10 + $0xb0] sm:$0xff] }
 0x956   :  { %v1244_v1 = vpop.f32.mrb[34].mxu1  ;;  %v3815_v63 = vcombine.low %v1378_v59, %v1386_v61  ;;  %v1405_v57 = vld [vmem:[%s5741_s10 + $0xf0] sm:$0xff] }
 0x957   :  { %1252 = vrot.lane.b32.xlu1 %v1244_v1, %s4668_s27  ;;  %v4325_v2 = vpop.f32.mrb[35].mxu1  ;;  %v3816_v1 = vcombine.high %v1378_v59, %v1386_v61  ;;  %v1398_v59 = vld [vmem:[%s5741_s10 + $0xb8] sm:$0xff]  ;;  %v3821_v61 = vcombine.low %v1381_v47, %v1389_v51 }
 0x9b7   :  { %v989_v3 = vpop.permute.xlu0 %988 }
 0x9b8   :  { %994 = vst.msk [vmem:[#allocation3] sm:$0xff] %vm438_vm14, %v989_v3 }
 0x9b9   :  { %v991_v4 = vpop.permute.xlu1 %990 }
 0x9ba   :  { %995 = vst.msk [vmem:[#allocation3 + $0x8] sm:$0xff] %vm438_vm14, %v991_v4 }
 0x9bf   :  { %v1120_v5 = vpop.permute.xlu0 %1119 }
 0x9c0   :  { %1125 = vst.msk [vmem:[#allocation3] sm:$0xff] %vm541_vm15, %v1120_v5 }
 0x9c1   :  { %v1122_v6 = vpop.permute.xlu1 %1121 }
 0x9c2   :  { %1126 = vst.msk [vmem:[#allocation3 + $0x8] sm:$0xff] %vm541_vm15, %v1122_v6 }
 0x9c7   :  { %v1251_v7 = vpop.permute.xlu0 %1250 }
 0x9c8   :  { %1256 = vst.msk [vmem:[#allocation3] sm:$0xff] %vm644_vm0, %v1251_v7 }
 0x9c9   :  { %v1253_v8 = vpop.permute.xlu1 %1252 }
 0x9ca   :  { %1257 = vst.msk [vmem:[#allocation3 + $0x8] sm:$0xff] %vm644_vm0, %v1253_v8 }
 0x9cf   :  { %v1258_v10 = vld [vmem:[#allocation3] sm:$0xff] }
 0x9d1   :  { %v1259_v11 = vld [vmem:[#allocation3 + $0x8] sm:$0xff] }
 0x9d2   :  { %v1264_v12 = vpack.c.bf16 %v1259_v11, %v1258_v10  ;;  %v3807_v11 = vld [vmem:[%s5745_s14] ss:$0 sm:$0xff] }
 0x9d4   :  { %4331 = vmatmul.mubr.msk.bf16.vlgmr.msra.gmra.mrb[28].mxu0 %vm153_vm3, %v1264_v12 }
 0x9d5   :  { %1730 = vmatprep.mubr.bf16.mxu0 %v4660_v9  ;;  %1699 = vmatpush1.bf16.msra.mxu0 %v3811_v45 }
 0x9d6   :  { %1700 = vmatprep.subr.bf16.mxu0 %v3828_v55 }
 0x9d9   :  { %1701 = vmatpush1.bf16.msra.mxu0 %v3827_v50  ;;  %v3822_v50 = vcombine.high %v1381_v47, %v1389_v51  ;;  %v1408_v51 = vld [vmem:[%s5742_s11] sm:$0xff] }
 0x9da   :  { %1784 = vmatprep.subr.bf16.mxu0 %v3816_v1 }
 0xaa7   :  { %v1321_v15 = vpop.f32.mrb[28].mxu0 }
 0xaa8   :  { %v1322_v16 = vadd.f32 %v3803_v14, %v1321_v15  ;;  %v4332_v17 = vpop.f32.mrb[29].mxu0 }
 0xaa9   :  { %v1324_v18 = vpop.f32.mrb[30].mxu0 }
 0xaaa   :  { %v1325_v41 = vadd.f32 %v3803_v14, %v1324_v18  ;;  %v4333_v19 = vpop.f32.mrb[31].mxu0  ;;  %v1328_v20 = vadd.f32 %v1322_v16, %v4941_v13  ;;  %v3808_v16 = vld [vmem:[%s5746_s15] ss:$0 sm:$0xff]  ;;  %v1393_v18 = vld [vmem:[%s5741_s10 + $0x90] sm:$0xff] }
 0xaab   :  { %v1394_v19 = vld [vmem:[%s5741_s10 + $0x98] sm:$0xff] }
 0xaac   :  { %v1332_v21 = vsel %vm153_vm3, %v1328_v20, 0.0  ;;  %v1329_v22 = vadd.f32 %v1325_v41, %v4943_v26  ;;  %v1375_v26 = vld [vmem:[%s5741_s10] sm:$0xff]  ;;  %v1401_v41 = vld [vmem:[%s5741_s10 + $0xd0] sm:$0xff] }
 0xaad   :  { %1333 = vadd.xlane.f32.xlu0 %v1332_v21  ;;  %v3810_v40 = vcombine.high %v1375_v26, %v1383_v37  ;;  %v3809_v44 = vcombine.low %v1375_v26, %v1383_v37  ;;  %v1395_v26 = vld [vmem:[%s5741_s10 + $0xa0] sm:$0xff] }
 0xaae   :  { %v1335_v23 = vsel %vm153_vm3, %v1329_v22, 0.0  ;;  %v1403_v37 = vld [vmem:[%s5741_s10 + $0xe0] sm:$0xff] }
 0xaaf   :  { %1336 = vadd.xlane.f32.xlu1 %v1335_v23  ;;  %1655 = vmatprep.subr.bf16.mxu1 %v3810_v40  ;;  %v1404_v40 = vld [vmem:[%s5741_s10 + $0xe8] sm:$0xff]  ;;  %v3834_v45 = vcombine.high %v1395_v26, %v1403_v37  ;;  %v3833_v53 = vcombine.low %v1395_v26, %v1403_v37  ;;  %v4439_v26 = vld [vmem:[%s5743_s12 + $0x78] sm:$0xff]  }
 0xab0   :  { %1656 = vmatpush1.bf16.msra.mxu1 %v3809_v44  ;;  %v3836_v46 = vcombine.high %v1396_v39, %v1404_v40  ;;  %v4440_v37 = vld [vmem:[%s5743_s12 + $0xf8] sm:$0xff]  }
 0xab1   :  { %1657 = vmatprep.subr.bf16.mxu1 %v3826_v52  ;;  %v1390_v52 = vld [vmem:[%s5741_s10 + $0x78] sm:$0xff] }
 0xab2   :  { %v3824_v55 = vcombine.high %v1382_v48, %v1390_v52 }
 0xab4   :  { %1658 = vmatpush1.bf16.msra.mxu1 %v3825_v54  ;;  %v3835_v54 = vcombine.low %v1396_v39, %v1404_v40  ;;  %v4441_v39 = vld [vmem:[%s5743_s12 + $0x38] sm:$0xff]  }
 0xab5   :  { %1741 = vmatprep.subr.bf16.mxu1 %v3814_v60  ;;  %v1406_v60 = vld [vmem:[%s5741_s10 + $0xf8] sm:$0xff] }
 0xab6   :  { %v3840_v1 = vcombine.high %v1398_v59, %v1406_v60  ;;  %v4442_v40 = vld [vmem:[%s5743_s12 + $0xb8] sm:$0xff]  }
 0xb3a   :  { %v1334_v24 = vpop.xlane.xlu0 %1333 }
 0xb3b   :  { %v1339_v25 = vmul.f32 0.03125, %v1334_v24  ;;  %v3830_v24 = vcombine.high %v1393_v18, %v1401_v41 }
 0xb3c   :  { %v1337_v27 = vpop.xlane.xlu1 %1336 }
 0xb3d   :  { %v1341_v31 = vsub.f32 %v1328_v20, %v1339_v25  ;;  %v1340_v32 = vmul.f32 0.03125, %v1337_v27  ;;  %v1402_v20 = vld [vmem:[%s5741_s10 + $0xd8] sm:$0xff]  ;;  %v1379_v27 = vld [vmem:[%s5741_s10 + $0x20] sm:$0xff] }
 0xb3e   :  { %v3832_v25 = vcombine.high %v1394_v19, %v1402_v20 }
 0xb3f   :  { %v1342_v33 = vsub.f32 %v1329_v22, %v1340_v32  ;;  %v1343_v34 = vmul.f32 %v1341_v31, %v1341_v31  ;;  %v1380_v32 = vld [vmem:[%s5741_s10 + $0x28] sm:$0xff] }
 0xb41   :  { %v1345_v35 = vsel %vm153_vm3, %v1343_v34, 0.0  ;;  %v1344_v36 = vmul.f32 %v1342_v33, %v1342_v33  ;;  %v3829_v34 = vcombine.low %v1393_v18, %v1401_v41  ;;  %v4424_v18 = vld [vmem:[%s5743_s12 + $0xd8] sm:$0xff]  }
 0xb42   :  { %1346 = vadd.xlane.f32.xlu0 %v1345_v35  ;;  %v3831_v35 = vcombine.low %v1394_v19, %v1402_v20  ;;  %v4425_v41 = vld [vmem:[%s5743_s12 + $0x18] sm:$0xff]   ;;  %v4427_v20 = vld [vmem:[%s5743_s12 + $0x60] sm:$0xff]  }
 0xb43   :  { %v1348_v13 = vsel %vm153_vm3, %v1344_v36, 0.0  ;;  %v4426_v19 = vld [vmem:[%s5743_s12 + $0x98] sm:$0xff]  }
 0xb46   :  { %1349 = vadd.xlane.f32.xlu0 %v1348_v13 }
 0xbcf   :  { %v1347_v2 = vpop.xlane.xlu0 %1346 }
 0xbd0   :  { %v1351_v3 = vmul.f32 0.03125, %v1347_v2  ;;  %v3837_v2 = vcombine.low %v1397_v56, %v1405_v57 }
 0xbd2   :  { %v1353_v4 = vadd.f32 1e-05, %v1351_v3  ;;  %v3839_v3 = vcombine.low %v1398_v59, %v1406_v60  ;;  %v1442_v59 = vsub.s32 7, %v4842_v28 }
 0xbd3   :  { %v1350_v5 = vpop.xlane.xlu0 %1349 }
 0xbd4   :  { %4617 = vrsqrt.f32 %v1353_v4  ;;  %v1352_v6 = vmul.f32 0.03125, %v1350_v5  ;;  %v4411_v4 = vld [vmem:[%s5743_s12 + $0x40] sm:$0xff]  }
 0xbd5   :  { %v4412_v5 = vld [vmem:[%s5743_s12 + $0xc0] sm:$0xff]  }
 0xbd6   :  { %v1354_v7 = vadd.f32 1e-05, %v1352_v6  ;;  %v4413_v6 = vld [vmem:[%s5743_s12] sm:$0xff]  }
 0xbd8   :  { %4619 = vrsqrt.f32 %v1354_v7  ;;  %v4414_v7 = vld [vmem:[%s5743_s12 + $0x80] sm:$0xff]  }
 0xbde   :  { %v4618_v8 = vpop.eup %4617 }
 0xbdf   :  { %v1357_v10 = vmul.f32 %v4618_v8, %v1341_v31  ;;  %v1387_v31 = vld [vmem:[%s5741_s10 + $0x60] sm:$0xff]  ;;  %v4415_v8 = vld [vmem:[%s5743_s12 + $0x48] sm:$0xff]  }
 0xbe0   :  { %v3818_v36 = vcombine.high %v1379_v27, %v1387_v31  ;;  %v3817_v42 = vcombine.low %v1379_v27, %v1387_v31  ;;  %v4431_v27 = vld [vmem:[%s5743_s12 + $0x68] sm:$0xff]  }
 0xbe1   :  { %v1365_v14 = vmul.f32 %v3807_v11, %v1357_v10  ;;  %v4417_v10 = vld [vmem:[%s5743_s12 + $0x8] sm:$0xff]  }
 0xbe2   :  { %v4620_v12 = vpop.eup %4619  ;;  %v4432_v31 = vld [vmem:[%s5743_s12 + $0xe8] sm:$0xff]  }
 0xbe3   :  { %v1358_v15 = vmul.f32 %v4620_v12, %v1342_v33  ;;  %v5102_v21 = vadd.f32 %v3808_v16, %v1365_v14  ;;  %v1388_v33 = vld [vmem:[%s5741_s10 + $0x68] sm:$0xff]  ;;  %v4419_v12 = vld [vmem:[%s5743_s12 + $0x50] sm:$0xff]  }
 0xbe4   :  { %v3820_v13 = vcombine.high %v1380_v32, %v1388_v33  ;;  %v3819_v44 = vcombine.low %v1380_v32, %v1388_v33  ;;  %v4420_v14 = vld [vmem:[%s5743_s12 + $0xd0] sm:$0xff]   ;;  %v4433_v32 = vld [vmem:[%s5743_s12 + $0x28] sm:$0xff]  }
 0xbe5   :  { %v1366_v17 = vmul.f32 %v3807_v11, %v1358_v15  ;;  %v4418_v11 = vld [vmem:[%s5743_s12 + $0x88] sm:$0xff]   ;;  %v4421_v15 = vld [vmem:[%s5743_s12 + $0x10] sm:$0xff]  }
 0xbe6   :  { %v4434_v33 = vld [vmem:[%s5743_s12 + $0xa8] sm:$0xff]  }
 0xbe7   :  { %v5104_v22 = vadd.f32 %v3808_v16, %v1366_v17  ;;  %v4422_v16 = vld [vmem:[%s5743_s12 + $0x90] sm:$0xff]   ;;  %v4423_v17 = vld [vmem:[%s5743_s12 + $0x58] sm:$0xff]  }
 0xbe9   :  { %v5108_v23 = vpack.c.bf16 %v5104_v22, %v5102_v21 }
 0xbeb   :  { %3841 = vmatmul.mubr.msk.bf16.vlgmr.msra.gmra.mrb[36].mxu1 %vm153_vm3, %v5108_v23  ;;  %3842 = vmatmul.mubr.msk.bf16.vlgmr.msra.gmra.mrb[32].mxu0 %vm153_vm3, %v5108_v23 }
 0xbec   :  { %1742 = vmatpush1.bf16.msra.mxu1 %v3813_v62  ;;  %1785 = vmatpush1.bf16.msra.mxu0 %v3815_v63  ;;  %v3823_v62 = vcombine.low %v1382_v48, %v1390_v52  ;;  %v3838_v63 = vcombine.high %v1397_v56, %v1405_v57  ;;  %v1415_v48 = vrot.slane %v1408_v51, %v4848_v30  ;;  %v1434_v57 = vsub.s32 5, %v4842_v28 }
 0xbed   :  { %1743 = vmatprep.subr.bf16.mxu1 %v3830_v24  ;;  %1786 = vmatprep.subr.bf16.mxu0 %v3832_v25  ;;  %v4429_v24 = vld [vmem:[%s5743_s12 + $0x20] sm:$0xff]   ;;  %v1423_v52 = vrot.slane %v1408_v51, %v4860_v43 }
 0xbee   :  { %1773 = vmatprep.mubr.bf16.mxu1 %v4660_v9  ;;  %1816 = vmatprep.mubr.bf16.mxu0 %v4660_v9  ;;  %v4430_v25 = vld [vmem:[%s5743_s12 + $0xa0] sm:$0xff]  }
 0xbf0   :  { %1744 = vmatpush1.bf16.msra.mxu1 %v3829_v34  ;;  %1787 = vmatpush1.bf16.msra.mxu0 %v3831_v35  ;;  %v4435_v34 = vld [vmem:[%s5743_s12 + $0x70] sm:$0xff]  }
 0xbf1   :  { %1827 = vmatprep.subr.bf16.mxu1 %v3818_v36  ;;  %1870 = vmatprep.subr.bf16.mxu0 %v3820_v13  ;;  %v4436_v35 = vld [vmem:[%s5743_s12 + $0xf0] sm:$0xff]  }
 0xbf2   :  { %v4437_v36 = vld [vmem:[%s5743_s12 + $0x30] sm:$0xff]  }
 0xbf3   :  { %3843 = vmatmul.mubr.msk.bf16.vlgmr.msra.gmra.mrb[40].mxu1 %vm153_vm3, %v5108_v23  ;;  %3844 = vmatmul.mubr.msk.bf16.vlgmr.msra.gmra.mrb[36].mxu0 %vm153_vm3, %v5108_v23  ;;  %v4438_v13 = vld [vmem:[%s5743_s12 + $0xb0] sm:$0xff]  }
 0xbf4   :  { %1828 = vmatpush1.bf16.msra.mxu1 %v3817_v42  ;;  %1871 = vmatpush1.bf16.msra.mxu0 %v3819_v44  ;;  %v4443_v42 = vld [vmem:[%s5743_s12 + $0x140] sm:$0xff]  }
 0xbf5   :  { %1829 = vmatprep.subr.bf16.mxu1 %v3834_v45  ;;  %1872 = vmatprep.subr.bf16.mxu0 %v3836_v46  ;;  %v4444_v44 = vld [vmem:[%s5743_s12 + $0x1c0] sm:$0xff]   ;;  %v1438_v45 = vsub.s32 6, %v4842_v28  ;;  %v5286_v46 = vld [vmem:[%s5742_s11 + $0x8] sm:$0xff] }
 0xbf6   :  { %1859 = vmatprep.mubr.bf16.mxu1 %v4660_v9  ;;  %1902 = vmatprep.mubr.bf16.mxu0 %v4660_v9 }
 0xbf7   :  { %v5289_v47 = vrot.slane %v5286_v46, %v1438_v45 }
 0xbf8   :  { %1830 = vmatpush1.bf16.msra.mxu1 %v3833_v53  ;;  %1873 = vmatpush1.bf16.msra.mxu0 %v3835_v54  ;;  %v1419_v53 = vrot.slane %v1408_v51, %v4845_v29  ;;  %v1427_v54 = vrot.slane %v1408_v51, %v4870_v58 }
 0xbf9   :  { %1913 = vmatprep.subr.bf16.mxu1 %v3822_v50  ;;  %1956 = vmatprep.subr.bf16.mxu0 %v3824_v55  ;;  %v1430_v50 = vsub.s32 4, %v4842_v28 }
 0xbfb   :  { %3845 = vmatmul.mubr.msk.bf16.vlgmr.msra.gmra.mrb[44].mxu1 %vm153_vm3, %v5108_v23  ;;  %3846 = vmatmul.mubr.msk.bf16.vlgmr.msra.gmra.mrb[40].mxu0 %vm153_vm3, %v5108_v23 }
 0xbfc   :  { %1914 = vmatpush1.bf16.msra.mxu1 %v3821_v61  ;;  %1957 = vmatpush1.bf16.msra.mxu0 %v3823_v62 }
 0xbfd   :  { %1915 = vmatprep.subr.bf16.mxu1 %v3838_v63  ;;  %1958 = vmatprep.subr.bf16.mxu0 %v3840_v1 }
 0xbfe   :  { %1945 = vmatprep.mubr.bf16.mxu1 %v4660_v9  ;;  %1988 = vmatprep.mubr.bf16.mxu0 %v4660_v9  ;;  %v4416_v9 = vld [vmem:[%s5743_s12 + $0xc8] sm:$0xff]  }
 0xc00   :  { %1916 = vmatpush1.bf16.msra.mxu1 %v3837_v2  ;;  %1959 = vmatpush1.bf16.msra.mxu0 %v3839_v3 }
 0xc01   :  { %4034 = vmatprep.subr.bf16.mxu1 %v4411_v4  ;;  %4056 = vmatprep.subr.bf16.mxu0 %v4412_v5 }
 0xc03   :  { %3847 = vmatmul.mubr.msk.bf16.vlgmr.msra.gmra.mrb[48].mxu1 %vm153_vm3, %v5108_v23  ;;  %3848 = vmatmul.mubr.msk.bf16.vlgmr.msra.gmra.mrb[44].mxu0 %vm153_vm3, %v5108_v23  ;;  %v4428_v23 = vld [vmem:[%s5743_s12 + $0xe0] sm:$0xff]  }
 0xc04   :  { %4035 = vmatpush3.bf16.msra.mxu1 %v4413_v6  ;;  %4057 = vmatpush3.bf16.msra.mxu0 %v4414_v7 }
 0xc05   :  { %4036 = vmatprep.subr.bf16.mxu1 %v4415_v8  ;;  %4058 = vmatprep.subr.bf16.mxu0 %v4416_v9  ;;  %v1431_v9 = vrot.slane %v1408_v51, %v1430_v50 }
 0xc08   :  { %4037 = vmatpush3.bf16.msra.mxu1 %v4417_v10  ;;  %4059 = vmatpush3.bf16.msra.mxu0 %v4418_v11  ;;  %v1439_v10 = vrot.slane %v1408_v51, %v1438_v45 }
 0xc09   :  { %4038 = vmatprep.subr.bf16.mxu1 %v4419_v12  ;;  %4060 = vmatprep.subr.bf16.mxu0 %v4420_v14  ;;  %v1435_v14 = vrot.slane %v1408_v51, %v1434_v57 }
 0xc0c   :  { %4039 = vmatpush3.bf16.msra.mxu1 %v4421_v15  ;;  %4061 = vmatpush3.bf16.msra.mxu0 %v4422_v16  ;;  %v1443_v15 = vrot.slane %v1408_v51, %v1442_v59 }
 0xc0d   :  { %4040 = vmatprep.subr.bf16.mxu1 %v4423_v17  ;;  %4062 = vmatprep.subr.bf16.mxu0 %v4424_v18 }
 0xc10   :  { %4041 = vmatpush3.bf16.msra.mxu1 %v4425_v41  ;;  %4063 = vmatpush3.bf16.msra.mxu0 %v4426_v19 }
 0xc11   :  { %4042 = vmatprep.subr.bf16.mxu1 %v4427_v20  ;;  %4064 = vmatprep.subr.bf16.mxu0 %v4428_v23 }
 0xc14   :  { %4043 = vmatpush3.bf16.msra.mxu1 %v4429_v24  ;;  %4065 = vmatpush3.bf16.msra.mxu0 %v4430_v25 }
 0xc15   :  { %4044 = vmatprep.subr.bf16.mxu1 %v4431_v27  ;;  %4066 = vmatprep.subr.bf16.mxu0 %v4432_v31 }
 0xc18   :  { %4045 = vmatpush3.bf16.msra.mxu1 %v4433_v32  ;;  %4067 = vmatpush3.bf16.msra.mxu0 %v4434_v33 }
 0xc19   :  { %4046 = vmatprep.subr.bf16.mxu1 %v4435_v34  ;;  %4068 = vmatprep.subr.bf16.mxu0 %v4436_v35  ;;  %v4445_v35 = vld [vmem:[%s5743_s12 + $0x100] sm:$0xff]  }
 0xc1c   :  { %4047 = vmatpush3.bf16.msra.mxu1 %v4437_v36  ;;  %4069 = vmatpush3.bf16.msra.mxu0 %v4438_v13  ;;  %v4446_v36 = vld [vmem:[%s5743_s12 + $0x180] sm:$0xff]  }
 0xc1d   :  { %4048 = vmatprep.subr.bf16.mxu1 %v4439_v26  ;;  %4070 = vmatprep.subr.bf16.mxu0 %v4440_v37 }
 0xc20   :  { %4049 = vmatpush3.bf16.msra.mxu1 %v4441_v39  ;;  %4071 = vmatpush3.bf16.msra.mxu0 %v4442_v40  ;;  %v4447_v40 = vld [vmem:[%s5743_s12 + $0x148] sm:$0xff]  }
 0xc21   :  { %4078 = vmatprep.subr.bf16.mxu1 %v4443_v42  ;;  %4100 = vmatprep.subr.bf16.mxu0 %v4444_v44  ;;  %v4448_v42 = vld [vmem:[%s5743_s12 + $0x1c8] sm:$0xff]   ;;  %v1447_v44 = vrot.slane %v5286_v46, %v4848_v30 }
 0xcbe   :  { %v1689_v55 = vpop.f32.mrb[36].mxu1  ;;  %v1732_v56 = vpop.f32.mrb[32].mxu0 }
 0xcbf   :  { %v1690_v60 = vadd.f32 %v1689_v55, %v1415_v48  ;;  %v1733_v61 = vadd.f32 %v1732_v56, %v1423_v52  ;;  %v1691_v62 = vpop.f32.mrb[37].mxu1  ;;  %v1734_v63 = vpop.f32.mrb[33].mxu0 }
 0xcc0   :  { %v1692_v1 = vadd.f32 %v1691_v62, %v1419_v53  ;;  %v1735_v2 = vadd.f32 %v1734_v63, %v1427_v54  ;;  %v1693_v3 = vpop.f32.mrb[38].mxu1  ;;  %v1736_v4 = vpop.f32.mrb[34].mxu0 }
 0xcc1   :  { %v1694_v5 = vadd.f32 %v1693_v3, %v1415_v48  ;;  %v1737_v6 = vadd.f32 %v1736_v4, %v1423_v52  ;;  %v1695_v7 = vpop.f32.mrb[39].mxu1  ;;  %v1738_v8 = vpop.f32.mrb[35].mxu0  ;;  %v1999_v16 = vmax.f32 %v1690_v60, 0.0  ;;  %v2001_v17 = vmax.f32 %v1733_v61, 0.0 }
 0xcc2   :  { %v1696_v11 = vadd.f32 %v1695_v7, %v1419_v53  ;;  %v1739_v12 = vadd.f32 %v1738_v8, %v1427_v54  ;;  %v2000_v19 = vmax.f32 %v1692_v1, 0.0  ;;  %v2002_v20 = vmax.f32 %v1735_v2, 0.0  ;;  %v4449_v1 = vld [vmem:[%s5743_s12 + $0x108] sm:$0xff]   ;;  %v4452_v7 = vld [vmem:[%s5743_s12 + $0x1d0] sm:$0xff]  }
 0xcc3   :  { %v2015_v18 = vmax.f32 %v1694_v5, 0.0  ;;  %v2017_v41 = vmax.f32 %v1737_v6, 0.0  ;;  %v1455_v53 = vrot.slane %v5286_v46, %v4860_v43  ;;  %v1451_v61 = vrot.slane %v5286_v46, %v4845_v29  ;;  %v4450_v43 = vld [vmem:[%s5743_s12 + $0x188] sm:$0xff]   ;;  %v4451_v29 = vld [vmem:[%s5743_s12 + $0x150] sm:$0xff]  }
 0xcc4   :  { %v2016_v23 = vmax.f32 %v1696_v11, 0.0  ;;  %v2018_v24 = vmax.f32 %v1739_v12, 0.0  ;;  %v1459_v2 = vrot.slane %v5286_v46, %v4870_v58 }
 0xcc5   :  { %v2287_v25 = vpack.c.bf16 %v2015_v18, %v1999_v16  ;;  %v2289_v27 = vpack.c.bf16 %v2017_v41, %v2001_v17  ;;  %v4453_v18 = vld [vmem:[%s5743_s12 + $0x110] sm:$0xff]  }
 0xcc6   :  { %v2288_v31 = vpack.c.bf16 %v2016_v23, %v2000_v19  ;;  %v2290_v32 = vpack.c.bf16 %v2018_v24, %v2002_v20  ;;  %v1775_v33 = vpop.f32.mrb[40].mxu1  ;;  %v1818_v34 = vpop.f32.mrb[36].mxu0  ;;  %v4454_v41 = vld [vmem:[%s5743_s12 + $0x190] sm:$0xff]  }
 0xcc7   :  { %v1776_v13 = vadd.f32 %v1775_v33, %v1431_v9  ;;  %v1819_v26 = vadd.f32 %v1818_v34, %v1439_v10  ;;  %v1777_v37 = vpop.f32.mrb[41].mxu1  ;;  %v1820_v39 = vpop.f32.mrb[37].mxu0 }
 0xcc8   :  { %v1778_v45 = vadd.f32 %v1777_v37, %v1435_v14  ;;  %v1821_v51 = vadd.f32 %v1820_v39, %v1443_v15  ;;  %v1779_v48 = vpop.f32.mrb[42].mxu1  ;;  %v1822_v52 = vpop.f32.mrb[38].mxu0  ;;  %3103 = vmatprep.mubr.bf16.mxu1 %v2288_v31  ;;  %3144 = vmatprep.mubr.bf16.mxu0 %v2290_v32  ;;  %v1463_v37 = vrot.slane %v5286_v46, %v1430_v50 }
 0xcc9   :  { %v1780_v54 = vadd.f32 %v1779_v48, %v1431_v9  ;;  %v1823_v55 = vadd.f32 %v1822_v52, %v1439_v10  ;;  %v1781_v56 = vpop.f32.mrb[43].mxu1  ;;  %v1824_v60 = vpop.f32.mrb[39].mxu0  ;;  %3104 = vmatmul.mubr.bf16.vlgmr.msra.gmra.mrb[52].mxu1 %v2287_v25  ;;  %3145 = vmatmul.mubr.bf16.vlgmr.msra.gmra.mrb[48].mxu0 %v2289_v27  ;;  %v2003_v3 = vmax.f32 %v1776_v13, 0.0  ;;  %v2005_v4 = vmax.f32 %v1819_v26, 0.0  ;;  %v4455_v25 = vld [vmem:[%s5743_s12 + $0x158] sm:$0xff]  }
 0xcca   :  { %v1782_v62 = vadd.f32 %v1781_v56, %v1435_v14  ;;  %v1825_v63 = vadd.f32 %v1824_v60, %v1443_v15  ;;  %4079 = vmatpush3.bf16.msra.mxu1 %v4445_v35  ;;  %4101 = vmatpush3.bf16.msra.mxu0 %v4446_v36  ;;  %v2004_v8 = vmax.f32 %v1778_v45, 0.0  ;;  %v2006_v9 = vmax.f32 %v1821_v51, 0.0  ;;  %v4456_v27 = vld [vmem:[%s5743_s12 + $0x1d8] sm:$0xff]  }
 0xccb   :  { %v2019_v5 = vmax.f32 %v1780_v54, 0.0  ;;  %v2021_v6 = vmax.f32 %v1823_v55, 0.0  ;;  %4080 = vmatprep.subr.bf16.mxu1 %v4447_v40  ;;  %4102 = vmatprep.subr.bf16.mxu0 %v4448_v42  ;;  %v1467_v39 = vrot.slane %v5286_v46, %v1434_v57  ;;  %v4457_v45 = vld [vmem:[%s5743_s12 + $0x118] sm:$0xff]   ;;  %v1475_v50 = vrot.slane %v5286_v46, %v1442_v59  ;;  %v4460_v54 = vld [vmem:[%s5743_s12 + $0x1e0] sm:$0xff]  }
 0xccc   :  { %v2020_v10 = vmax.f32 %v1782_v62, 0.0  ;;  %v2022_v11 = vmax.f32 %v1825_v63, 0.0 }
 0xccd   :  { %v5339_v12 = vpack.c.bf16 %v2019_v5, %v2003_v3  ;;  %v5341_v58 = vpack.c.bf16 %v2021_v6, %v2005_v4 }
 0xcce   :  { %v2292_v14 = vpack.c.bf16 %v2020_v10, %v2004_v8  ;;  %v2294_v15 = vpack.c.bf16 %v2022_v11, %v2006_v9  ;;  %4081 = vmatpush3.bf16.msra.mxu1 %v4449_v1  ;;  %4103 = vmatpush3.bf16.msra.mxu0 %v4450_v43  ;;  %v1861_v16 = vpop.f32.mrb[44].mxu1  ;;  %v1904_v17 = vpop.f32.mrb[40].mxu0  ;;  %v4461_v43 = vld [vmem:[%s5743_s12 + $0x120] sm:$0xff]  }
 0xccf   :  { %v1862_v19 = vadd.f32 %v1861_v16, %v1447_v44  ;;  %v1905_v20 = vadd.f32 %v1904_v17, %v1455_v53  ;;  %v1863_v23 = vpop.f32.mrb[45].mxu1  ;;  %v1906_v24 = vpop.f32.mrb[41].mxu0  ;;  %4082 = vmatprep.subr.bf16.mxu1 %v4451_v29  ;;  %4104 = vmatprep.subr.bf16.mxu0 %v4452_v7  ;;  %v4463_v29 = vld [vmem:[%s5743_s12 + $0x168] sm:$0xff]  }
 0xcd0   :  { %v1864_v31 = vadd.f32 %v1863_v23, %v1451_v61  ;;  %v1907_v32 = vadd.f32 %v1906_v24, %v1459_v2  ;;  %v1865_v33 = vpop.f32.mrb[46].mxu1  ;;  %v1908_v34 = vpop.f32.mrb[42].mxu0  ;;  %3185 = vmatprep.mubr.bf16.mxu1 %v2292_v14  ;;  %3226 = vmatprep.mubr.bf16.mxu0 %v2294_v15  ;;  %v4464_v7 = vld [vmem:[%s5743_s12 + $0x1e8] sm:$0xff]  }
 0xcd1   :  { %v1866_v35 = vadd.f32 %v1865_v33, %v1447_v44  ;;  %v1909_v36 = vadd.f32 %v1908_v34, %v1455_v53  ;;  %v1867_v13 = vpop.f32.mrb[47].mxu1  ;;  %v1910_v26 = vpop.f32.mrb[43].mxu0  ;;  %v4458_v44 = vld [vmem:[%s5743_s12 + $0x198] sm:$0xff]   ;;  %v2007_v51 = vmax.f32 %v1862_v19, 0.0  ;;  %v2009_v48 = vmax.f32 %v1905_v20, 0.0  ;;  %v4459_v53 = vld [vmem:[%s5743_s12 + $0x160] sm:$0xff]  }
 0xcd2   :  { %v1868_v40 = vadd.f32 %v1867_v13, %v1451_v61  ;;  %v1911_v42 = vadd.f32 %v1910_v26, %v1459_v2  ;;  %4083 = vmatpush3.bf16.msra.mxu1 %v4453_v18  ;;  %4105 = vmatpush3.bf16.msra.mxu0 %v4454_v41  ;;  %v2008_v55 = vmax.f32 %v1864_v31, 0.0  ;;  %v2010_v56 = vmax.f32 %v1907_v32, 0.0  ;;  %v4462_v2 = vld [vmem:[%s5743_s12 + $0x1a0] sm:$0xff]   ;;  %v4465_v19 = vld [vmem:[%s5743_s12 + $0x128] sm:$0xff]   ;;  %v4468_v31 = vld [vmem:[%s5743_s12 + $0x1f0] sm:$0xff]  }
 0xcd3   :  { %v2023_v52 = vmax.f32 %v1866_v35, 0.0  ;;  %v2025_v57 = vmax.f32 %v1909_v36, 0.0  ;;  %4084 = vmatprep.subr.bf16.mxu1 %v4455_v25  ;;  %4106 = vmatprep.subr.bf16.mxu0 %v4456_v27  ;;  %v4466_v20 = vld [vmem:[%s5743_s12 + $0x1a8] sm:$0xff]  }
 0xcd4   :  { %v2024_v60 = vmax.f32 %v1868_v40, 0.0  ;;  %v2026_v28 = vmax.f32 %v1911_v42, 0.0  ;;  %v4470_v40 = vld [vmem:[%s5743_s12 + $0x1b0] sm:$0xff]   ;;  %v4471_v42 = vld [vmem:[%s5743_s12 + $0x178] sm:$0xff]  }
 0xcd5   :  { %v5376_v61 = vpack.c.bf16 %v2023_v52, %v2007_v51  ;;  %v5378_v46 = vpack.c.bf16 %v2025_v57, %v2009_v48  ;;  %v4475_v51 = vld [vmem:[%s5743_s12 + $0x240] sm:$0xff]  }
 0xcd6   :  { %v5380_v59 = vpack.c.bf16 %v2024_v60, %v2008_v55  ;;  %v5382_v62 = vpack.c.bf16 %v2026_v28, %v2010_v56  ;;  %4085 = vmatpush3.bf16.msra.mxu1 %v4457_v45  ;;  %4107 = vmatpush3.bf16.msra.mxu0 %v4458_v44  ;;  %v1947_v63 = vpop.f32.mrb[48].mxu1  ;;  %v1990_v1 = vpop.f32.mrb[44].mxu0  ;;  %v4472_v45 = vld [vmem:[%s5743_s12 + $0x1f8] sm:$0xff]   ;;  %v4476_v48 = vld [vmem:[%s5743_s12 + $0x2c0] sm:$0xff]   ;;  %v4481_v55 = vld [vmem:[%s5743_s12 + $0x208] sm:$0xff]  }
 0xcd7   :  { %v1948_v3 = vadd.f32 %v1947_v63, %v1463_v37  ;;  %v1991_v4 = vadd.f32 %v1990_v1, %v5289_v47  ;;  %v1949_v5 = vpop.f32.mrb[49].mxu1  ;;  %v1992_v6 = vpop.f32.mrb[45].mxu0  ;;  %4086 = vmatprep.subr.bf16.mxu1 %v4459_v53  ;;  %4108 = vmatprep.subr.bf16.mxu0 %v4460_v54  ;;  %v4473_v44 = vld [vmem:[%s5743_s12 + $0x138] sm:$0xff]   ;;  %v4477_v52 = vld [vmem:[%s5743_s12 + $0x200] sm:$0xff]   ;;  %v4479_v53 = vld [vmem:[%s5743_s12 + $0x248] sm:$0xff]  }
 0xcd8   :  { %v1950_v8 = vadd.f32 %v1949_v5, %v1467_v39  ;;  %v1993_v9 = vadd.f32 %v1992_v6, %v1475_v50  ;;  %v1951_v10 = vpop.f32.mrb[50].mxu1  ;;  %v1994_v11 = vpop.f32.mrb[46].mxu0  ;;  %v4478_v57 = vld [vmem:[%s5743_s12 + $0x280] sm:$0xff]   ;;  %v4480_v54 = vld [vmem:[%s5743_s12 + $0x2c8] sm:$0xff]   ;;  %v4485_v60 = vld [vmem:[%s5743_s12 + $0x210] sm:$0xff]  }
 0xcd9   :  { %v1952_v14 = vadd.f32 %v1951_v10, %v1463_v37  ;;  %v1995_v15 = vadd.f32 %v1994_v11, %v5289_v47  ;;  %v1953_v16 = vpop.f32.mrb[51].mxu1  ;;  %v1996_v17 = vpop.f32.mrb[47].mxu0  ;;  %v2011_v23 = vmax.f32 %v1948_v3, 0.0  ;;  %v2013_v24 = vmax.f32 %v1991_v4, 0.0  ;;  %v4467_v47 = vld [vmem:[%s5743_s12 + $0x170] sm:$0xff]   ;;  %v4482_v56 = vld [vmem:[%s5743_s12 + $0x288] sm:$0xff]  }
 0xcda   :  { %v1954_v18 = vadd.f32 %v1953_v16, %v1467_v39  ;;  %v1997_v41 = vadd.f32 %v1996_v17, %v1475_v50  ;;  %4087 = vmatpush3.bf16.msra.mxu1 %v4461_v43  ;;  %4109 = vmatpush3.bf16.msra.mxu0 %v4462_v2  ;;  %v2012_v32 = vmax.f32 %v1950_v8, 0.0  ;;  %v2014_v33 = vmax.f32 %v1993_v9, 0.0  ;;  %v4469_v39 = vld [vmem:[%s5743_s12 + $0x130] sm:$0xff]   ;;  %v4474_v50 = vld [vmem:[%s5743_s12 + $0x1b8] sm:$0xff]   ;;  %v4491_v43 = vld [vmem:[%s5743_s12 + $0x260] sm:$0xff]  }
 0xcdb   :  { %v2027_v25 = vmax.f32 %v1952_v14, 0.0  ;;  %v2029_v27 = vmax.f32 %v1995_v15, 0.0  ;;  %4088 = vmatprep.subr.bf16.mxu1 %v4463_v29  ;;  %4110 = vmatprep.subr.bf16.mxu0 %v4464_v7  ;;  %v4486_v28 = vld [vmem:[%s5743_s12 + $0x290] sm:$0xff]   ;;  %v4489_v63 = vld [vmem:[%s5743_s12 + $0x218] sm:$0xff]   ;;  %v4492_v2 = vld [vmem:[%s5743_s12 + $0x2e0] sm:$0xff]  }
 0xcdc   :  { %v2028_v34 = vmax.f32 %v1954_v18, 0.0  ;;  %v2030_v35 = vmax.f32 %v1997_v41, 0.0  ;;  %v4490_v1 = vld [vmem:[%s5743_s12 + $0x298] sm:$0xff]   ;;  %v4493_v3 = vld [vmem:[%s5743_s12 + $0x220] sm:$0xff]   ;;  %v4495_v5 = vld [vmem:[%s5743_s12 + $0x268] sm:$0xff]  }
 0xcdd   :  { %v5410_v36 = vpack.c.bf16 %v2027_v25, %v2011_v23  ;;  %v5412_v13 = vpack.c.bf16 %v2029_v27, %v2013_v24  ;;  %v4494_v4 = vld [vmem:[%s5743_s12 + $0x2a0] sm:$0xff]   ;;  %v4496_v6 = vld [vmem:[%s5743_s12 + $0x2e8] sm:$0xff]   ;;  %v4499_v8 = vld [vmem:[%s5743_s12 + $0x270] sm:$0xff]  }
 0xcde   :  { %v5414_v26 = vpack.c.bf16 %v2028_v34, %v2012_v32  ;;  %v5416_v37 = vpack.c.bf16 %v2030_v35, %v2014_v33  ;;  %4089 = vmatpush3.bf16.msra.mxu1 %v4465_v19  ;;  %4111 = vmatpush3.bf16.msra.mxu0 %v4466_v20  ;;  %v4497_v29 = vld [vmem:[%s5743_s12 + $0x228] sm:$0xff]   ;;  %v4500_v9 = vld [vmem:[%s5743_s12 + $0x2f0] sm:$0xff]   ;;  %v4503_v14 = vld [vmem:[%s5743_s12 + $0x278] sm:$0xff]  }
 0xcdf   :  { %4090 = vmatprep.subr.bf16.mxu1 %v4467_v47  ;;  %4112 = vmatprep.subr.bf16.mxu0 %v4468_v31  ;;  %v4498_v7 = vld [vmem:[%s5743_s12 + $0x2a8] sm:$0xff]   ;;  %v4501_v10 = vld [vmem:[%s5743_s12 + $0x230] sm:$0xff]   ;;  %v4504_v15 = vld [vmem:[%s5743_s12 + $0x2f8] sm:$0xff]  }
 0xce0   :  { %v4502_v11 = vld [vmem:[%s5743_s12 + $0x2b0] sm:$0xff]   ;;  %v4505_v16 = vld [vmem:[%s5743_s12 + $0x238] sm:$0xff]   ;;  %v4507_v18 = vld [vmem:[%s5743_s12 + $0x340] sm:$0xff]  }
 0xce1   :  { %v4506_v17 = vld [vmem:[%s5743_s12 + $0x2b8] sm:$0xff]   ;;  %v4508_v41 = vld [vmem:[%s5743_s12 + $0x3c0] sm:$0xff]   ;;  %v4511_v23 = vld [vmem:[%s5743_s12 + $0x348] sm:$0xff]  }
 0xce2   :  { %4091 = vmatpush3.bf16.msra.mxu1 %v4469_v39  ;;  %4113 = vmatpush3.bf16.msra.mxu0 %v4470_v40  ;;  %v4509_v19 = vld [vmem:[%s5743_s12 + $0x300] sm:$0xff]   ;;  %v4512_v24 = vld [vmem:[%s5743_s12 + $0x3c8] sm:$0xff]   ;;  %v4517_v47 = vld [vmem:[%s5743_s12 + $0x310] sm:$0xff]  }
 0xce3   :  { %4092 = vmatprep.subr.bf16.mxu1 %v4471_v42  ;;  %4114 = vmatprep.subr.bf16.mxu0 %v4472_v45  ;;  %v4510_v20 = vld [vmem:[%s5743_s12 + $0x380] sm:$0xff]   ;;  %v4513_v25 = vld [vmem:[%s5743_s12 + $0x308] sm:$0xff]   ;;  %v4518_v31 = vld [vmem:[%s5743_s12 + $0x390] sm:$0xff]  }
 0xce4   :  { %v4514_v27 = vld [vmem:[%s5743_s12 + $0x388] sm:$0xff]   ;;  %v4519_v32 = vld [vmem:[%s5743_s12 + $0x358] sm:$0xff]   ;;  %v4525_v39 = vld [vmem:[%s5743_s12 + $0x320] sm:$0xff]  }
 0xce5   :  { %v4520_v33 = vld [vmem:[%s5743_s12 + $0x3d8] sm:$0xff]   ;;  %v4526_v40 = vld [vmem:[%s5743_s12 + $0x3a0] sm:$0xff]   ;;  %v4527_v42 = vld [vmem:[%s5743_s12 + $0x368] sm:$0xff]  }
 0xce6   :  { %4093 = vmatpush3.bf16.msra.mxu1 %v4473_v44  ;;  %4115 = vmatpush3.bf16.msra.mxu0 %v4474_v50  ;;  %v4521_v34 = vld [vmem:[%s5743_s12 + $0x318] sm:$0xff]   ;;  %v4528_v45 = vld [vmem:[%s5743_s12 + $0x3e8] sm:$0xff]  }
 0xce7   :  { %4122 = vmatprep.subr.bf16.mxu1 %v4475_v51  ;;  %4144 = vmatprep.subr.bf16.mxu0 %v4476_v48  ;;  %v4522_v35 = vld [vmem:[%s5743_s12 + $0x398] sm:$0xff]   ;;  %v4529_v44 = vld [vmem:[%s5743_s12 + $0x328] sm:$0xff]   ;;  %v4531_v51 = vld [vmem:[%s5743_s12 + $0x370] sm:$0xff]  }
 0xce8   :  { %v4530_v50 = vld [vmem:[%s5743_s12 + $0x3a8] sm:$0xff]   ;;  %v4532_v48 = vld [vmem:[%s5743_s12 + $0x3f0] sm:$0xff]  }
 0xce9   :  { %3186 = vmatmul.mubr.bf16.vlgmr.msra.gmra.mrb[56].mxu1 %v5339_v12  ;;  %3227 = vmatmul.mubr.bf16.vlgmr.msra.gmra.mrb[52].mxu0 %v5341_v58  ;;  %v4483_v12 = vld [vmem:[%s5743_s12 + $0x250] sm:$0xff]  }
 0xcea   :  { %4123 = vmatpush3.bf16.msra.mxu1 %v4477_v52  ;;  %3267 = vmatprep.mubr.bf16.mxu1 %v5380_v59  ;;  %v4484_v58 = vld [vmem:[%s5743_s12 + $0x2d0] sm:$0xff]   ;;  %v4487_v59 = vld [vmem:[%s5743_s12 + $0x258] sm:$0xff]  }
 0xceb   :  { %4145 = vmatpush3.bf16.msra.mxu0 %v4478_v57  ;;  %3308 = vmatprep.mubr.bf16.mxu0 %v5382_v62  ;;  %v4488_v62 = vld [vmem:[%s5743_s12 + $0x2d8] sm:$0xff]   ;;  %v4533_v52 = vld [vmem:[%s5743_s12 + $0x330] sm:$0xff]  }
 0xcec   :  { %4124 = vmatprep.subr.bf16.mxu1 %v4479_v53  ;;  %4146 = vmatprep.subr.bf16.mxu0 %v4480_v54  ;;  %v4534_v57 = vld [vmem:[%s5743_s12 + $0x3b0] sm:$0xff]   ;;  %v4535_v53 = vld [vmem:[%s5743_s12 + $0x378] sm:$0xff]  }
 0xced   :  { %v4536_v54 = vld [vmem:[%s5743_s12 + $0x3f8] sm:$0xff]  }
 0xcee   :  { %4125 = vmatpush3.bf16.msra.mxu1 %v4481_v55  ;;  %v4537_v55 = vld [vmem:[%s5743_s12 + $0x338] sm:$0xff]  }
 0xcef   :  { %4147 = vmatpush3.bf16.msra.mxu0 %v4482_v56  ;;  %4126 = vmatprep.subr.bf16.mxu1 %v4483_v12  ;;  %v4538_v56 = vld [vmem:[%s5743_s12 + $0x3b8] sm:$0xff]  }
 0xcf0   :  { %4148 = vmatprep.subr.bf16.mxu0 %v4484_v58 }
 0xcf2   :  { %4127 = vmatpush3.bf16.msra.mxu1 %v4485_v60 }
 0xcf3   :  { %4149 = vmatpush3.bf16.msra.mxu0 %v4486_v28  ;;  %4128 = vmatprep.subr.bf16.mxu1 %v4487_v59 }
 0xcf4   :  { %4150 = vmatprep.subr.bf16.mxu0 %v4488_v62 }
 0xcf6   :  { %4129 = vmatpush3.bf16.msra.mxu1 %v4489_v63 }
 0xcf7   :  { %4151 = vmatpush3.bf16.msra.mxu0 %v4490_v1  ;;  %4130 = vmatprep.subr.bf16.mxu1 %v4491_v43 }
 0xcf8   :  { %4152 = vmatprep.subr.bf16.mxu0 %v4492_v2 }
 0xcfa   :  { %4131 = vmatpush3.bf16.msra.mxu1 %v4493_v3 }
 0xcfb   :  { %4153 = vmatpush3.bf16.msra.mxu0 %v4494_v4  ;;  %4132 = vmatprep.subr.bf16.mxu1 %v4495_v5 }
 0xcfc   :  { %4154 = vmatprep.subr.bf16.mxu0 %v4496_v6 }
 0xcfe   :  { %4133 = vmatpush3.bf16.msra.mxu1 %v4497_v29 }
 0xcff   :  { %4155 = vmatpush3.bf16.msra.mxu0 %v4498_v7  ;;  %4134 = vmatprep.subr.bf16.mxu1 %v4499_v8 }
 0xd00   :  { %4156 = vmatprep.subr.bf16.mxu0 %v4500_v9 }
 0xd02   :  { %4135 = vmatpush3.bf16.msra.mxu1 %v4501_v10 }
 0xd03   :  { %4157 = vmatpush3.bf16.msra.mxu0 %v4502_v11  ;;  %4136 = vmatprep.subr.bf16.mxu1 %v4503_v14 }
 0xd04   :  { %4158 = vmatprep.subr.bf16.mxu0 %v4504_v15 }
 0xd06   :  { %4137 = vmatpush3.bf16.msra.mxu1 %v4505_v16 }
 0xd07   :  { %4159 = vmatpush3.bf16.msra.mxu0 %v4506_v17  ;;  %4166 = vmatprep.subr.bf16.mxu1 %v4507_v18 }
 0xd08   :  { %4188 = vmatprep.subr.bf16.mxu0 %v4508_v41 }
 0xd09   :  { %3268 = vmatmul.mubr.bf16.vlgmr.msra.gmra.mrb[60].mxu1 %v5376_v61  ;;  %v4515_v61 = vld [vmem:[%s5743_s12 + $0x350] sm:$0xff]  }
 0xd0a   :  { %3309 = vmatmul.mubr.bf16.vlgmr.msra.gmra.mrb[56].mxu0 %v5378_v46  ;;  %4167 = vmatpush3.bf16.msra.mxu1 %v4509_v19  ;;  %v4516_v46 = vld [vmem:[%s5743_s12 + $0x3d0] sm:$0xff]  }
 0xd0b   :  { %3349 = vmatprep.mubr.bf16.mxu1 %v5414_v26  ;;  %4189 = vmatpush3.bf16.msra.mxu0 %v4510_v20  ;;  %v4523_v26 = vld [vmem:[%s5743_s12 + $0x360] sm:$0xff]  }
 0xd0c   :  { %3390 = vmatprep.mubr.bf16.mxu0 %v5416_v37  ;;  %4168 = vmatprep.subr.bf16.mxu1 %v4511_v23  ;;  %v4524_v37 = vld [vmem:[%s5743_s12 + $0x3e0] sm:$0xff]  }
 0xd0d   :  { %4190 = vmatprep.subr.bf16.mxu0 %v4512_v24 }
 0xd0e   :  { %4169 = vmatpush3.bf16.msra.mxu1 %v4513_v25 }
 0xd0f   :  { %4191 = vmatpush3.bf16.msra.mxu0 %v4514_v27  ;;  %4170 = vmatprep.subr.bf16.mxu1 %v4515_v61 }
 0xd10   :  { %4192 = vmatprep.subr.bf16.mxu0 %v4516_v46 }
 0xd12   :  { %4171 = vmatpush3.bf16.msra.mxu1 %v4517_v47 }
 0xd13   :  { %4193 = vmatpush3.bf16.msra.mxu0 %v4518_v31  ;;  %4172 = vmatprep.subr.bf16.mxu1 %v4519_v32 }
 0xd14   :  { %4194 = vmatprep.subr.bf16.mxu0 %v4520_v33 }
 0xd16   :  { %4173 = vmatpush3.bf16.msra.mxu1 %v4521_v34 }
 0xd17   :  { %4195 = vmatpush3.bf16.msra.mxu0 %v4522_v35  ;;  %4174 = vmatprep.subr.bf16.mxu1 %v4523_v26 }
 0xd18   :  { %4196 = vmatprep.subr.bf16.mxu0 %v4524_v37 }
 0xd1a   :  { %4175 = vmatpush3.bf16.msra.mxu1 %v4525_v39 }
 0xd1b   :  { %4197 = vmatpush3.bf16.msra.mxu0 %v4526_v40  ;;  %4176 = vmatprep.subr.bf16.mxu1 %v4527_v42 }
 0xd1c   :  { %4198 = vmatprep.subr.bf16.mxu0 %v4528_v45 }
 0xd1e   :  { %4177 = vmatpush3.bf16.msra.mxu1 %v4529_v44 }
 0xd1f   :  { %4199 = vmatpush3.bf16.msra.mxu0 %v4530_v50  ;;  %4178 = vmatprep.subr.bf16.mxu1 %v4531_v51 }
 0xd20   :  { %4200 = vmatprep.subr.bf16.mxu0 %v4532_v48 }
 0xd22   :  { %4179 = vmatpush3.bf16.msra.mxu1 %v4533_v52 }
 0xd23   :  { %4201 = vmatpush3.bf16.msra.mxu0 %v4534_v57  ;;  %4180 = vmatprep.subr.bf16.mxu1 %v4535_v53 }
 0xd24   :  { %4202 = vmatprep.subr.bf16.mxu0 %v4536_v54 }
 0xd26   :  { %4181 = vmatpush3.bf16.msra.mxu1 %v4537_v55 }
 0xd27   :  { %4203 = vmatpush3.bf16.msra.mxu0 %v4538_v56  ;;  %4334 = vmatprep.subr.bf16.mxu1 %v4657_v0 }
 0xd28   :  { %4342 = vmatprep.subr.bf16.mxu0 %v4657_v0 }
 0xd29   :  { %3350 = vmatmul.mubr.bf16.vlgmr.msra.gmra.mrb[64].mxu1 %v5410_v36 }
 0xd2a   :  { %3391 = vmatmul.mubr.bf16.vlgmr.msra.gmra.mrb[60].mxu0 %v5412_v13  ;;  %4338 = vmatprep.mubr.msk.bf16.mxu1 %vm4658_vm1, %v4657_v0 }
 0xd2b   :  { %4358 = vmatprep.mubr.msk.bf16.mxu0 %vm4658_vm1, %v4657_v0 }
 0xd9c   :  { %v4050_v12 = vpop.f32.mrb[52].mxu1  ;;  %v4072_v58 = vpop.f32.mrb[48].mxu0 }
 0xd9d   :  { %v4051_v60 = vpop.f32.mrb[53].mxu1  ;;  %v4073_v28 = vpop.f32.mrb[49].mxu0 }
 0xd9e   :  { %v4052_v59 = vadd.f32 %v4051_v60, %v4050_v12  ;;  %v4074_v62 = vadd.f32 %v4073_v28, %v4072_v58  ;;  %v4053_v63 = vpop.f32.mrb[54].mxu1  ;;  %v4075_v1 = vpop.f32.mrb[50].mxu0  ;;  %v3977_v28 = vld [vmem:[%s5744_s13] ss:$0 sm:$0xff]  ;;  %s4677_s13 = smov [#allocation4]  }
 0xd9f   :  { %v4054_v43 = vpop.f32.mrb[55].mxu1  ;;  %v4076_v2 = vpop.f32.mrb[51].mxu0  ;;  %s3767_s11 = sshll.u32 %s4677_s13, 4  ;;  %s3768_s11 = int_to_ptr.vmem [resolvable:$true] %s3767_s11 }
 0xda0   :  { %v3147_v3 = vadd.f32 %v4074_v62, %v4052_v59  ;;  %v4055_v36 = vadd.f32 %v4054_v43, %v4053_v63  ;;  %v4077_v4 = vadd.f32 %v4076_v2, %v4075_v1  ;;  %s4633_s6 = scalar_lea.vmem %s3768_s11, 256  ;;  %p4638_p1 = scmp.lt.s32.totalorder %s3768_s11, %s3768_s11 }
 0xda1   :  { %p4634_p0 = scmp.ne.s32.totalorder %s3768_s11, %s4633_s6  ;;  %p4639_p2 = scmp.lt.s32.totalorder %s4633_s6, %s4633_s6 }
 0xda2   :  { %v3150_v13 = vadd.f32 %v4077_v4, %v4055_v36 }
 0xda3   :  { %p4640_p3 = por %p4639_p2, %p4638_p1 }
 0xda5   :  { %p4641_p4 = pnand %p4640_p3, %p4634_p0 }
 0xdbc   :  { %v4094_v5 = vpop.f32.mrb[56].mxu1  ;;  %v4116_v6 = vpop.f32.mrb[52].mxu0 }
 0xdbd   :  { %v4095_v29 = vpop.f32.mrb[57].mxu1  ;;  %v4117_v7 = vpop.f32.mrb[53].mxu0 }
 0xdbe   :  { %v4096_v8 = vadd.f32 %v4095_v29, %v4094_v5  ;;  %v4118_v9 = vadd.f32 %v4117_v7, %v4116_v6  ;;  %v4097_v10 = vpop.f32.mrb[58].mxu1  ;;  %v4119_v11 = vpop.f32.mrb[54].mxu0 }
 0xdbf   :  { %v4098_v14 = vpop.f32.mrb[59].mxu1  ;;  %v4120_v15 = vpop.f32.mrb[55].mxu0 }
 0xdc0   :  { %v3188_v16 = vadd.f32 %v4096_v8, %v3147_v3  ;;  %v4099_v17 = vadd.f32 %v4098_v14, %v4097_v10  ;;  %v4121_v18 = vadd.f32 %v4120_v15, %v4119_v11  ;;  %v4540_v10 = vld [vmem:[%s5749_s18 + $0x8] sm:$0xff]   ;;  %v4541_v11 = vld [vmem:[%s5750_s19] sm:$0xff]   ;;  %v4543_v15 = vld [vmem:[%s5750_s19 + $0x10] sm:$0xff]  }
 0xdc1   :  { %4343 = vmatpush3.bf16.msra.mxu0 %v4541_v11  ;;  %v4542_v14 = vld [vmem:[%s5750_s19 + $0x8] sm:$0xff]  }
 0xdc2   :  { %v3229_v41 = vadd.f32 %v4118_v9, %v3188_v16  ;;  %v3191_v19 = vadd.f32 %v4099_v17, %v3150_v13  ;;  %v4539_v9 = vld [vmem:[%s5749_s18] sm:$0xff]   ;;  %4344 = vmatprep.subr.bf16.mxu0 %v4657_v0  ;;  %v4544_v16 = vld [vmem:[%s5750_s19 + $0x18] sm:$0xff]  }
 0xdc3   :  { %4335 = vmatpush3.bf16.msra.mxu1 %v4539_v9  ;;  %v4545_v17 = vld [vmem:[%s5750_s19 + $0x20] sm:$0xff]  }
 0xdc4   :  { %v3232_v20 = vadd.f32 %v4121_v18, %v3191_v19  ;;  %4336 = vmatprep.subr.bf16.mxu1 %v4657_v0  ;;  %v4546_v18 = vld [vmem:[%s5750_s19 + $0x28] sm:$0xff]  }
 0xdc5   :  { %4345 = vmatpush3.bf16.msra.mxu0 %v4542_v14 }
 0xdc6   :  { %4346 = vmatprep.subr.bf16.mxu0 %v4657_v0 }
 0xdc7   :  { %4337 = vmatpush3.bf16.msra.mxu1 %v4540_v10 }
 0xdc8   :  { %4362 = vmatprep.subr.bf16.mxu1 %v4657_v0 }
 0xdc9   :  { %4347 = vmatpush3.bf16.msra.mxu0 %v4543_v15 }
 0xdca   :  { %4348 = vmatprep.subr.bf16.mxu0 %v4657_v0 }
 0xdcd   :  { %4349 = vmatpush3.bf16.msra.mxu0 %v4544_v16 }
 0xdce   :  { %4350 = vmatprep.subr.bf16.mxu0 %v4657_v0 }
 0xdd1   :  { %4351 = vmatpush3.bf16.msra.mxu0 %v4545_v17 }
 0xdd2   :  { %4352 = vmatprep.subr.bf16.mxu0 %v4657_v0 }
 0xdd5   :  { %4353 = vmatpush3.bf16.msra.mxu0 %v4546_v18  ;;  %v3991_v18 = vld [vmem:[%s5752_s21] ss:$0 sm:$0xff] }
 0xdd6   :  { %4354 = vmatprep.subr.bf16.mxu0 %v4657_v0 }
 0xddc   :  { %v4138_v23 = vpop.f32.mrb[60].mxu1 }
 0xddd   :  { %v4160_v24 = vpop.f32.mrb[56].mxu0  ;;  %v4139_v25 = vpop.f32.mrb[61].mxu1 }
 0xdde   :  { %v4140_v27 = vadd.f32 %v4139_v25, %v4138_v23  ;;  %v4161_v61 = vpop.f32.mrb[57].mxu0  ;;  %v4141_v46 = vpop.f32.mrb[62].mxu1 }
 0xddf   :  { %v4162_v47 = vadd.f32 %v4161_v61, %v4160_v24  ;;  %v4163_v31 = vpop.f32.mrb[58].mxu0  ;;  %v4142_v32 = vpop.f32.mrb[63].mxu1 }
 0xde0   :  { %v3270_v33 = vadd.f32 %v4140_v27, %v3229_v41  ;;  %v4143_v34 = vadd.f32 %v4142_v32, %v4141_v46  ;;  %v4164_v35 = vpop.f32.mrb[59].mxu0  ;;  %v4547_v41 = vld [vmem:[%s5750_s19 + $0x30] sm:$0xff]   ;;  %v3978_v46 = vld [vmem:[%s5747_s16] ss:$0 sm:$0xff] }
 0xde1   :  { %v4165_v26 = vadd.f32 %v4164_v35, %v4163_v31  ;;  %4355 = vmatpush3.bf16.msra.mxu0 %v4547_v41 }
 0xde2   :  { %v3311_v37 = vadd.f32 %v4162_v47, %v3270_v33  ;;  %v3273_v39 = vadd.f32 %v4143_v34, %v3232_v20  ;;  %4356 = vmatprep.subr.bf16.mxu0 %v4657_v0  ;;  %v3979_v34 = vld [vmem:[%s5748_s17] ss:$0 sm:$0xff] }
 0xde4   :  { %v3314_v40 = vadd.f32 %v4165_v26, %v3273_v39 }
 0xdfc   :  { %v4182_v42 = vpop.f32.mrb[64].mxu1 }
 0xdfd   :  { %v4204_v45 = vpop.f32.mrb[60].mxu0  ;;  %v4183_v44 = vpop.f32.mrb[65].mxu1 }
 0xdfe   :  { %v4184_v50 = vadd.f32 %v4183_v44, %v4182_v42  ;;  %v4205_v51 = vpop.f32.mrb[61].mxu0  ;;  %v4185_v48 = vpop.f32.mrb[66].mxu1 }
 0xdff   :  { %v4206_v52 = vadd.f32 %v4205_v51, %v4204_v45  ;;  %v4207_v57 = vpop.f32.mrb[62].mxu0  ;;  %v4186_v53 = vpop.f32.mrb[67].mxu1 }
 0xe00   :  { %v3352_v54 = vadd.f32 %v4184_v50, %v3311_v37  ;;  %v4187_v55 = vadd.f32 %v4186_v53, %v4185_v48  ;;  %v4208_v56 = vpop.f32.mrb[63].mxu0  ;;  %v3621_v48 = vld [vmem:[%s5751_s20] sm:$0x1] }
 0xe01   :  { %v4209_v12 = vadd.f32 %v4208_v56, %v4207_v57 }
 0xe02   :  { %v3393_v58 = vadd.f32 %v4206_v52, %v3352_v54  ;;  %v3355_v60 = vadd.f32 %v4187_v55, %v3314_v40  ;;  %v4548_v40 = vld [vmem:[%s5750_s19 + $0x38] sm:$0xff]  }
 0xe03   :  { %4357 = vmatpush3.bf16.msra.mxu0 %v4548_v40 }
 0xe04   :  { %v3396_v59 = vadd.f32 %v4209_v12, %v3355_v60  ;;  %v3399_v62 = vadd.f32 %v3393_v58, %v5102_v21 }
 0xe06   :  { %v3408_v63 = vadd.f32 %v3977_v28, %v3399_v62  ;;  %v3400_v1 = vadd.f32 %v3396_v59, %v5104_v22 }
 0xe08   :  { %v3412_v43 = vsel %vm153_vm3, %v3408_v63, 0.0  ;;  %v3409_v2 = vadd.f32 %v3977_v28, %v3400_v1 }
 0xe09   :  { %3413 = vadd.xlane.f32.xlu1 %v3412_v43 }
 0xe0a   :  { %v3415_v3 = vsel %vm153_vm3, %v3409_v2, 0.0 }
 0xe0b   :  { %3416 = vadd.xlane.f32.xlu0 %v3415_v3 }
 0xe96   :  { %v3414_v36 = vpop.xlane.xlu1 %3413 }
 0xe97   :  { %v3418_v4 = vmul.f32 0.03125, %v3414_v36 }
 0xe98   :  { %v3417_v13 = vpop.xlane.xlu0 %3416 }
 0xe99   :  { %v3420_v5 = vsub.f32 %v3408_v63, %v3418_v4  ;;  %v3419_v6 = vmul.f32 0.03125, %v3417_v13 }
 0xe9b   :  { %v3421_v29 = vsub.f32 %v3409_v2, %v3419_v6  ;;  %v3422_v7 = vmul.f32 %v3420_v5, %v3420_v5 }
 0xe9d   :  { %v3424_v8 = vsel %vm153_vm3, %v3422_v7, 0.0  ;;  %v3423_v21 = vmul.f32 %v3421_v29, %v3421_v29 }
 0xe9e   :  { %3425 = vadd.xlane.f32.xlu1 %v3424_v8 }
 0xe9f   :  { %v3427_v22 = vsel %vm153_vm3, %v3423_v21, 0.0 }
 0xea0   :  { %3428 = vadd.xlane.f32.xlu0 %v3427_v22 }
 0xf2b   :  { %v3426_v19 = vpop.xlane.xlu1 %3425 }
 0xf2c   :  { %v3430_v20 = vmul.f32 0.03125, %v3426_v19 }
 0xf2d   :  { %v3429_v23 = vpop.xlane.xlu0 %3428 }
 0xf2e   :  { %v3432_v24 = vadd.f32 1e-05, %v3430_v20  ;;  %v3431_v25 = vmul.f32 0.03125, %v3429_v23 }
 0xf30   :  { %4621 = vrsqrt.f32 %v3432_v24  ;;  %v3433_v27 = vadd.f32 1e-05, %v3431_v25 }
 0xf32   :  { %4623 = vrsqrt.f32 %v3433_v27 }
 0xf3a   :  { %v4622_v61 = vpop.eup %4621 }
 0xf3b   :  { %v3436_v47 = vmul.f32 %v4622_v61, %v3420_v5 }
 0xf3c   :  { %v4624_v31 = vpop.eup %4623 }
 0xf3d   :  { %v3444_v32 = vmul.f32 %v3978_v46, %v3436_v47  ;;  %v3437_v33 = vmul.f32 %v4624_v31, %v3421_v29 }
 0xf3f   :  { %v3445_v35 = vmul.f32 %v3978_v46, %v3437_v33  ;;  %v3452_v26 = vadd.f32 %v3979_v34, %v3444_v32 }
 0xf41   :  { %v3453_v37 = vadd.f32 %v3979_v34, %v3445_v35 }
 0xf43   :  { %v3458_v39 = vpack.c.bf16 %v3453_v37, %v3452_v26 }
 0xf45   :  { %4339 = vmatmul.mubr.msk.bf16.vlgmr.msra.gmra.mrb[68].mxu1 %vm153_vm3, %v3458_v39 }
 0xf46   :  { %4364 = vmatprep.mubr.msk.bf16.mxu1 %vm4658_vm1, %v4657_v0 }
0x1018   :  { %v3508_v42 = vpop.f32.mrb[68].mxu1 }
0x1019   :  { %v4340_v45 = vpop.f32.mrb[69].mxu1 }
0x101a   :  { %v3511_v44 = vpop.f32.mrb[70].mxu1 }
0x101b   :  { %v3531_v50 = vpack.c.bf16 %v3511_v44, %v3508_v42  ;;  %v4341_v51 = vpop.f32.mrb[71].mxu1 }
0x101d   :  { %4359 = vmatmul.mubr.bf16.vlgmr.msra.gmra.mrb[64].mxu0 %v3531_v50  ;;  %4363 = vmatpush3.bf16.xpose.msra.mxu1 %v3531_v50 }
0x101e   :  { %4368 = vmatprep.subr.bf16.mxu1 %v4657_v0 }
0x1024   :  { %4365 = vmatmul.mubr.bf16.vlgmr.msra.gmra.mrb[72].mxu1 %v3621_v48 }
0x1025   :  { %4369 = vmatpush3.bf16.msra.mxu1 %v3531_v50  ;;  %4370 = vmatprep.mubr.msk.bf16.mxu1 %vm4658_vm1, %v4657_v0 }
0x10f0   :  { %v3614_v52 = vpop.f32.mrb[64].mxu0 }
0x10f1   :  { %3664 = vperm.xlu1 %4402, %v3614_v52   ;;  %v4360_v57 = vpop.f32.mrb[65].mxu0 }
0x10f2   :  { %v3617_v53 = vpop.f32.mrb[66].mxu0 }
0x10f3   :  { %3669 = vperm.xlu0 %4403, %v3617_v53   ;;  %v4361_v54 = vpop.f32.mrb[67].mxu0 }
0x10f7   :  { %v3656_v55 = vpop.f32.mrb[72].mxu1 }
0x10f8   :  { %v4366_v56 = vpop.f32.mrb[73].mxu1  ;;  %v3675_v60 = vrot.slane %v3656_v55, %v4848_v30 }
0x10f9   :  { %v3659_v12 = vpop.f32.mrb[74].mxu1 }
0x10fa   :  { %v4367_v58 = vpop.f32.mrb[75].mxu1 }
0x1170   :  { %v3665_v28 = vpop.permute.xlu1 %3664 }
0x1171   :  { %v3676_v59 = vadd.f32 %v3675_v60, %v3665_v28 }
0x1172   :  { %v3670_v62 = vpop.permute.xlu0 %3669 }
0x1173   :  { %vm3678_vm3 = vcmp.gt.f32.partialorder %v3676_v59, 0.0  ;;  %v3680_v63 = vmul.f32 0.2, %v3676_v59  ;;  %v3677_v1 = vadd.f32 %v3675_v60, %v3670_v62 }
0x1175   :  { %vm3679_vm5 = vcmp.gt.f32.partialorder %v3677_v1, 0.0  ;;  %v3681_v0 = vmul.f32 0.2, %v3677_v1  ;;  %v3682_v43 = vsel %vm3678_vm3, %v3676_v59, %v3680_v63 }
0x1176   :  { %v3684_v2 = vadd.f32 %v4857_v38, %v3682_v43 }
0x1177   :  { %v3683_v3 = vsel %vm3679_vm5, %v3677_v1, %v3681_v0 }
0x1178   :  { %v3686_v36 = vsel %vm266_vm6, %v3684_v2, -inf  ;;  %v3685_v4 = vadd.f32 %v4863_v49, %v3683_v3 }
0x1179   :  { %3687 = vmax.xlane.f32.xlu1 %v3686_v36 }
0x117a   :  { %v3689_v13 = vsel %vm266_vm6, %v3685_v4, -inf }
0x117b   :  { %3690 = vmax.xlane.f32.xlu0 %v3689_v13 }
0x1206   :  { %v3688_v30 = vpop.xlane.xlu1 %3687 }
0x1207   :  { %v3692_v5 = vsub.f32 %v3684_v2, %v3688_v30 }
0x1208   :  { %v3691_v6 = vpop.xlane.xlu0 %3690 }
0x1209   :  { %v3694_v29 = vmul.f32 1.442695, %v3692_v5  ;;  %v3693_v7 = vsub.f32 %v3685_v4, %v3691_v6 }
0x120b   :  { %4625 = vpow2.f32 %v3694_v29  ;;  %v3696_v8 = vmul.f32 1.442695, %v3693_v7 }
0x120d   :  { %4627 = vpow2.f32 %v3696_v8 }
0x1215   :  { %v4626_v21 = vpop.eup %4625 }
0x1216   :  { %v3698_v38 = vsel %vm266_vm6, %v4626_v21, 0.0 }
0x1217   :  { %v4628_v22 = vpop.eup %4627  ;;  %3699 = vadd.xlane.f32.xlu1 %v3698_v38 }
0x1218   :  { %v3701_v9 = vsel %vm266_vm6, %v4628_v22, 0.0 }
0x121b   :  { %3702 = vadd.xlane.f32.xlu1 %v3701_v9 }
0x12a4   :  { %v3700_v49 = vpop.xlane.xlu1 %3699 }
0x12a5   :  { %4629 = vrcp.f32 %v3700_v49 }
0x12a8   :  { %v3703_v10 = vpop.xlane.xlu1 %3702 }
0x12a9   :  { %4631 = vrcp.f32 %v3703_v10 }
0x12af   :  { %v4630_v11 = vpop.eup %4629 }
0x12b0   :  { %v3706_v15 = vmul.f32 %v4630_v11, %v4626_v21 }
0x12b3   :  { %v4632_v14 = vpop.eup %4631 }
0x12b4   :  { %v3707_v16 = vmul.f32 %v4632_v14, %v4628_v22 }
0x12b6   :  { %v3708_v17 = vpack.c.bf16 %v3707_v16, %v3706_v15 }
0x12b8   :  { %4371 = vmatmul.mubr.msk.bf16.vlgmr.msra.gmra.mrb[76].mxu1 %vm266_vm6, %v3708_v17 }
0x138b   :  { %v3753_v41 = vpop.f32.mrb[76].mxu1 }
0x138c   :  { %v3754_v19 = vadd.f32 %v3991_v18, %v3753_v41  ;;  %v4372_v20 = vpop.f32.mrb[77].mxu1 }
0x138d   :  { %v3756_v23 = vpop.f32.mrb[78].mxu1 }
0x138e   :  { %3760 = vst [vmem:[#allocation4] sm:$0xff] %v3754_v19  ;;  %v3757_v24 = vadd.f32 %v3991_v18, %v3756_v23  ;;  %v4373_v25 = vpop.f32.mrb[79].mxu1 }
0x1390   :  { %3761 = vst [vmem:[#allocation4 + $0x8] sm:$0xff] %v3757_v24 }
0x1391   :  { %4644 = shalt.err (!%p4641_p4)
}
0x1392   :  { %s4645_s4 = scalar_lea.hbm %s5753_s22, 256 }
0x1393   :  { %p4646_p5 = scmp.ne.s32.totalorder %s5753_s22, %s4645_s4  ;;  %p4649_p6 = scmp.lt.u32.totalorder %s4645_s4, %s5753_s22 }
0x1395   :  { %p4651_p7 = pnand %p4649_p6, %p4646_p5 }
0x1397   :  { %4654 = shalt.err (!%p4651_p7)
}
0x1398   :  { %s4678_s28 = smov 128  }
0x1399   :  { %3773 = dma.vmem_to_hbm [thread:$0]  %s3768_s11, 256, %s5753_s22, [#allocation5], %s4678_s28, %s4678_s28, %s4666_s26  }
0x139a   :  { %4655 = dma.done.wait [#allocation5], 256  }
0x139b   :  { %4656 = vsyncadd [#allocation5], 4294967040 }
0x139c   :  { %3777 = vsyncpa [#allocation5], 1 }

</bundles_post_ra>
